<compile_context>
chip_gen: v5e
topology: v5e:2x2
jax: 0.10.0
libtpu: 0.0.40
codegen_flags: <defaults>
</compile_context>

<pallas_src>
from math import ceil

import numpy as np
import jax
import jax.numpy as jnp
from jax.experimental import pallas as pl
from jax.experimental.pallas import tpu as pltpu

BN_EPS = 1e-5      # torch.nn.BatchNorm1d default
SIM_EPS = 1e-8     # sim_matrix eps
ENT_EPS = 1e-15    # torch_geometric dense_diff_pool EPS


def _dotT(a, b):
    # a @ b.T without an explicit in-kernel transpose (contract last dims).
    return jax.lax.dot_general(
        a, b, (((1,), (1,)), ((), ())), preferred_element_type=jnp.float32)


# ---------------------------------------------------------------------------
# Fused kernel: TAG hot path + TeamEncoder loss terms.
#   inputs : x (N,F), adj (N,N), stacked conv weights w1/w2/w3, lin1 weight wl,
#            packed small vectors vec (10, max(H,O)):
#              rows 0..2 : b1_rel, bn1_gamma, bn1_beta      (width H)
#              rows 3..5 : b2_rel, bn2_gamma, bn2_beta      (width H)
#              rows 6..8 : b3_rel, bn3_gamma, bn3_beta      (width O, padded)
#              row  9    : lin1 bias                        (width O, padded)
#   outputs: emb (N, 2H+O)  concatenated per-layer embedding
#            s   (N, O)     soft assignment (softmax1 already applied)
#            loss (1, 128)  lane 0 = ||s s^T - adj||_F, lane 1 = entropy e1,
#                           lane 2 = cosine-sim term
# ---------------------------------------------------------------------------
def fused_tag_kernel(x_ref, adj_ref, w1_ref, w2_ref, w3_ref, wl_ref, vec_ref,
                     emb_ref, s_ref, loss_ref):
    x = x_ref[...]          # (N, F)
    adj = adj_ref[...]      # (N, N)
    vec = vec_ref[...]      # (10, max(H, O))
    hidden = w1_ref.shape[1]
    out_ch = w3_ref.shape[1]
    n_nodes = x.shape[0]

    def conv_bn_relu(xin, w, b, g, be):
        # DenseGraphConv(aggr='add'): lin_rel(adj @ x) + lin_root(x), fused as
        # one matmul on [agg | xin] with the stacked weight.
        agg = jnp.dot(adj, xin, preferred_element_type=jnp.float32)
        cat = jnp.concatenate([agg, xin], axis=-1)
        out = jnp.dot(cat, w, preferred_element_type=jnp.float32) + b
        out = jnp.maximum(out, 0.0)                       # .relu()
        # BatchNorm1d over flattened (batch*nodes, C) = (N, C), training-mode
        # (biased batch variance), then affine.
        mean = jnp.mean(out, axis=0, keepdims=True)
        var = jnp.mean((out - mean) ** 2, axis=0, keepdims=True)
        return (out - mean) * jax.lax.rsqrt(var + BN_EPS) * g + be

    x1 = conv_bn_relu(x, w1_ref[...],
                      vec[0:1, :hidden], vec[1:2, :hidden], vec[2:3, :hidden])
    x2 = conv_bn_relu(x1, w2_ref[...],
                      vec[3:4, :hidden], vec[4:5, :hidden], vec[5:6, :hidden])
    x3 = conv_bn_relu(x2, w3_ref[...],
                      vec[6:7, :out_ch], vec[7:8, :out_ch], vec[8:9, :out_ch])

    # Concatenated embedding emitted directly; lin1 as a single K=2H+O matmul.
    emb = jnp.concatenate([x1, x2, x3], axis=-1)          # (N, 2H+O)
    emb_ref[...] = emb

    logits = (jnp.dot(emb, wl_ref[...], preferred_element_type=jnp.float32)
              + vec[9:10, :out_ch])
    logits = jnp.maximum(logits, 0.0)                     # lin1(...).relu()
    m = jnp.max(logits, axis=-1, keepdims=True)           # softmax1 (dim=-1)
    e = jnp.exp(logits - m)
    s = e / jnp.sum(e, axis=-1, keepdims=True)
    s_ref[...] = s

    # --- loss terms (adj / x / s already resident, no second launch) --------
    # norm = || s s^T - adj ||_F
    tmp = _dotT(s, s) - adj
    norm = jnp.sqrt(jnp.sum(tmp * tmp, axis=(0, 1), keepdims=True))

    # dense_diff_pool entropy term: it re-softmaxes s internally.
    m2 = jnp.max(s, axis=-1, keepdims=True)
    es = jnp.exp(s - m2)
    ss = es / jnp.sum(es, axis=-1, keepdims=True)
    ent = -jnp.sum(ss * jnp.log(ss + ENT_EPS), axis=-1, keepdims=True)
    e1 = jnp.sum(ent, axis=(0, 1), keepdims=True) / n_nodes

    # sim = -sum(diag(sim_matrix(sim_matrix(x,x), sim_matrix(s,s)))) / N
    def cos_sim_mat(a):
        nrm = jnp.sqrt(jnp.sum(a * a, axis=1, keepdims=True))
        an = a / jnp.maximum(nrm, SIM_EPS)
        return _dotT(an, an)

    a_mat = cos_sim_mat(x)       # (N, N)
    b_mat = cos_sim_mat(s)       # (N, N)
    an = a_mat / jnp.maximum(
        jnp.sqrt(jnp.sum(a_mat * a_mat, axis=1, keepdims=True)), SIM_EPS)
    bn = b_mat / jnp.maximum(
        jnp.sqrt(jnp.sum(b_mat * b_mat, axis=1, keepdims=True)), SIM_EPS)
    sim = -jnp.sum(an * bn, axis=(0, 1), keepdims=True) / n_nodes

    # Pack the three scalars into one lane-dense (1, 128) row (one unmasked
    # store instead of three padded (1,1) outputs).
    lane = jax.lax.broadcasted_iota(jnp.int32, (1, 128), 1)
    loss_ref[...] = jnp.where(lane == 0, norm,
                    jnp.where(lane == 1, e1,
                    jnp.where(lane == 2, sim, 0.0)))


# ---------------------------------------------------------------------------
# Parameter init (deterministic, synthetic -- shapes follow the torch module)
# ---------------------------------------------------------------------------
def init_params(key, f_in, hidden, out_ch):
    ks = iter(jax.random.split(key, 16))

    def lin_w(o, i):
        return jax.random.normal(next(ks), (o, i), jnp.float32) * (1.0 / (i ** 0.5))

    def lin_b(o):
        return jax.random.normal(next(ks), (o,), jnp.float32) * 0.05

    p = {}
    p['w1_rel'], p['b1_rel'], p['w1_root'] = lin_w(hidden, f_in), lin_b(hidden), lin_w(hidden, f_in)
    p['w2_rel'], p['b2_rel'], p['w2_root'] = lin_w(hidden, hidden), lin_b(hidden), lin_w(hidden, hidden)
    p['w3_rel'], p['b3_rel'], p['w3_root'] = lin_w(out_ch, hidden), lin_b(out_ch), lin_w(out_ch, hidden)
    for i, c in [(1, hidden), (2, hidden), (3, out_ch)]:
        p[f'bn{i}_g'] = jnp.ones((c,), jnp.float32)    # torch BatchNorm default
        p[f'bn{i}_b'] = jnp.zeros((c,), jnp.float32)
    emb_dim = 2 * hidden + out_ch
    p['lin1_w'] = lin_w(out_ch, emb_dim)
    p['lin1_b'] = lin_b(out_ch)
    return p


# ---------------------------------------------------------------------------
# Wrapper: full TeamEncoder.forward
# ---------------------------------------------------------------------------
def team_encoder_forward(x, adj, sample_teams, sample_replaces, params,
                         attentions, pad_id):
    n, f_in = x.shape
    hidden = params['w1_rel'].shape[0]
    out_ch = params['w3_rel'].shape[0]
    emb_dim = 2 * hidden + out_ch

    # ---- host-side parameter packing (fewer, larger DMAs) ------------------
    w1 = jnp.concatenate([params['w1_rel'].T, params['w1_root'].T], axis=0)  # (2F, H)
    w2 = jnp.concatenate([params['w2_rel'].T, params['w2_root'].T], axis=0)  # (2H, H)
    w3 = jnp.concatenate([params['w3_rel'].T, params['w3_root'].T], axis=0)  # (2H, O)
    wl = params['lin1_w'].T                                                  # (E, O)

    pack_w = max(hidden, out_ch)

    def pad_vec(v):
        return jnp.pad(v, (0, pack_w - v.shape[0]))

    vec = jnp.stack([
        pad_vec(params['b1_rel']), pad_vec(params['bn1_g']), pad_vec(params['bn1_b']),
        pad_vec(params['b2_rel']), pad_vec(params['bn2_g']), pad_vec(params['bn2_b']),
        pad_vec(params['b3_rel']), pad_vec(params['bn3_g']), pad_vec(params['bn3_b']),
        pad_vec(params['lin1_b']),
    ])                                                                       # (10, pack_w)

    vmem = pl.BlockSpec(memory_space=pltpu.MemorySpace.VMEM)

    # Advisory cost estimate for XLA scheduling around the custom call.
    flops = int(2 * n * (n * f_in + 2 * f_in * hidden
                         + n * hidden + 2 * hidden * hidden
                         + n * hidden + 2 * hidden * out_ch
                         + emb_dim * out_ch
                         + n * out_ch + n * f_in + n * out_ch))
    bytes_accessed = int(4 * (x.size + adj.size + w1.size + w2.size + w3.size
                              + wl.size + vec.size
                              + n * emb_dim + n * out_ch + 128))
    cost = pl.CostEstimate(flops=flops,
                           transcendentals=int(3 * n * out_ch + 8 * n + 8),
                           bytes_accessed=bytes_accessed)

    embedding, s1, losses = pl.pallas_call(
        fused_tag_kernel,
        out_shape=(jax.ShapeDtypeStruct((n, emb_dim), jnp.float32),
                   jax.ShapeDtypeStruct((n, out_ch), jnp.float32),
                   jax.ShapeDtypeStruct((1, 128), jnp.float32)),
        in_specs=[vmem] * 7,
        out_specs=(vmem, vmem, vmem),
        cost_estimate=cost,
    )(x, adj, w1, w2, w3, wl, vec)

    norm, e1, sim = losses[0, 0], losses[0, 1], losses[0, 2]

    # --- team / sample / remain embeddings ----------------------------------
    # TODO(synk): team membership / padding-id removal is data-dependent
    # Python set/index logic with no clean Pallas equivalent; the index arrays
    # are baked at trace time and the gathers + weighted sums run as a few
    # batched XLA ops (one gather + masked softmax + einsum per group) instead
    # of a per-team Python loop.
    appended_x = jnp.concatenate(
        [embedding, jnp.zeros((1, emb_dim), jnp.float32)], axis=0)
    zero_row = n
    num_teams = len(sample_teams)

    att_mat = jnp.stack(attentions)                          # (T, max_len)
    team_idx = jnp.asarray(sample_teams, jnp.int32)          # (T, max_len)
    team_w = jax.nn.softmax(att_mat, axis=-1)
    team_emb = jnp.einsum('tl,tle->te', team_w, appended_x[team_idx])  # noqa: F841 (kept for parity; unused in loss)

    rem_lists = [sorted(set(t) - set(r) - {pad_id})
                 for t, r in zip(sample_teams, sample_replaces)]

    def build(idx_lists, width):
        node = np.full((num_teams, width), zero_row, np.int32)
        pos = np.zeros((num_teams, width), np.int32)
        mask = np.zeros((num_teams, width), np.float32)
        for i, lst in enumerate(idx_lists):
            for j, node_id in enumerate(lst):
                node[i, j] = node_id
                pos[i, j] = sample_teams[i].index(node_id)
                mask[i, j] = 1.0
        return jnp.asarray(node), jnp.asarray(pos), jnp.asarray(mask)

    def subset_embedding(node, pos, mask):
        att = jnp.take_along_axis(att_mat, pos, axis=1)
        att = jnp.where(mask > 0, att, -1e30)                # masked softmax == subset softmax
        w = jax.nn.softmax(att, axis=-1)
        return jnp.einsum('tw,twe->te', w, appended_x[node])

    max_rep = max(len(r) for r in sample_replaces)
    max_rem = max(len(r) for r in rem_lists)
    sample_emb = subset_embedding(*build(sample_replaces, max_rep))
    remain_emb = subset_embedding(*build(rem_lists, max_rem))

    diff = sample_emb - remain_emb                           # (T, E)
    embedding_loss = jnp.sum(jnp.sqrt(jnp.sum(diff * diff, axis=-1))) / num_teams

    total_loss = 100.0 * norm + 10.0 * e1 + 100.0 * sim + embedding_loss
    return s1, norm, e1, sim, total_loss, embedding_loss, embedding, attentions


if __name__ == "__main__":
    key = jax.random.PRNGKey(0)
    kx, kadj, kp, katt = jax.random.split(key, 4)

    # Small, forward-consistent shapes.
    n_nodes, num_features = 16, 8
    max_nodes = 160
    out_ch = ceil(max_nodes / 20)        # 8  (diff-pool cluster count)
    hidden = 32
    max_len = 4
    pad_id = n_nodes                     # synthetic stand-in for pad node 15004
    sample_teams = [[0, 3, 5, pad_id], [2, 7, 9, 11]]
    sample_replaces = [[3], [7, 9]]

    x = jax.random.normal(kx, (n_nodes, num_features), jnp.float32)
    adj = (jax.random.uniform(kadj, (n_nodes, n_nodes)) < 0.3).astype(jnp.float32)
    adj = jnp.maximum(adj, adj.T) * (1.0 - jnp.eye(n_nodes, dtype=jnp.float32))

    params = init_params(kp, num_features, hidden, out_ch)
    attentions = [jax.random.uniform(k, (max_len,), jnp.float32, -0.5, 0.5)
                  for k in jax.random.split(katt, len(sample_teams))]

    out = team_encoder_forward(x, adj, sample_teams, sample_replaces,
                               params, attentions, pad_id)
    jax.block_until_ready(out)
    print("KERNEL_OK")
</pallas_src>

<mosaic_0001>
module attributes {stable_mosaic.version = 11 : i64} {
  func.func @fused_tag_kernel(%arg0: memref<16x8xf32, #tpu.memory_space<vmem>>, %arg1: memref<16x16xf32, #tpu.memory_space<vmem>>, %arg2: memref<16x32xf32, #tpu.memory_space<vmem>>, %arg3: memref<64x32xf32, #tpu.memory_space<vmem>>, %arg4: memref<64x8xf32, #tpu.memory_space<vmem>>, %arg5: memref<72x8xf32, #tpu.memory_space<vmem>>, %arg6: memref<10x32xf32, #tpu.memory_space<vmem>>, %arg7: memref<16x72xf32, #tpu.memory_space<vmem>>, %arg8: memref<16x8xf32, #tpu.memory_space<vmem>>, %arg9: memref<1x128xf32, #tpu.memory_space<vmem>>) attributes {dimension_semantics = [], scalar_prefetch = 0 : i64, scratch_operands = 0 : i64, tpu.core_type = #tpu.core_type<tc>} {
    %c0 = arith.constant 0 : index
    %c0_0 = arith.constant 0 : index
    %0 = vector.load %arg0[%c0, %c0_0] : memref<16x8xf32, #tpu.memory_space<vmem>>, vector<16x8xf32>
    %c0_1 = arith.constant 0 : index
    %c0_2 = arith.constant 0 : index
    %1 = vector.load %arg1[%c0_1, %c0_2] : memref<16x16xf32, #tpu.memory_space<vmem>>, vector<16x16xf32>
    %c0_3 = arith.constant 0 : index
    %c0_4 = arith.constant 0 : index
    %2 = vector.load %arg6[%c0_3, %c0_4] : memref<10x32xf32, #tpu.memory_space<vmem>>, vector<10x32xf32>
    %c0_5 = arith.constant 0 : index
    %c0_6 = arith.constant 0 : index
    %3 = vector.load %arg2[%c0_5, %c0_6] : memref<16x32xf32, #tpu.memory_space<vmem>>, vector<16x32xf32>
    %4 = vector.extract_strided_slice %2 {offsets = [0, 0], sizes = [1, 32], strides = [1, 1]} : vector<10x32xf32> to vector<1x32xf32>
    %5 = vector.extract_strided_slice %2 {offsets = [1, 0], sizes = [1, 32], strides = [1, 1]} : vector<10x32xf32> to vector<1x32xf32>
    %6 = vector.extract_strided_slice %2 {offsets = [2, 0], sizes = [1, 32], strides = [1, 1]} : vector<10x32xf32> to vector<1x32xf32>
    %cst = arith.constant dense<0.000000e+00> : vector<16x8xf32>
    %7 = tpu.matmul %1, %0, %cst {dimension_numbers = #tpu.dot_dimension_numbers<[1], [0], [0], [1], [0, 0, 1, 1], [], []>} : vector<16x16xf32>, vector<16x8xf32>, vector<16x8xf32> -> vector<16x8xf32>
    %8 = tpu.concatenate %7, %0 in 1 : vector<16x8xf32>, vector<16x8xf32> -> vector<16x16xf32>
    %cst_7 = arith.constant dense<0.000000e+00> : vector<16x32xf32>
    %9 = tpu.matmul %8, %3, %cst_7 {dimension_numbers = #tpu.dot_dimension_numbers<[1], [0], [0], [1], [0, 0, 1, 1], [], []>} : vector<16x16xf32>, vector<16x32xf32>, vector<16x32xf32> -> vector<16x32xf32>
    %10 = vector.broadcast %4 : vector<1x32xf32> to vector<16x32xf32>
    %11 = arith.addf %9, %10 : vector<16x32xf32>
    %cst_8 = arith.constant 0.000000e+00 : f32
    %12 = vector.broadcast %cst_8 : f32 to vector<16x32xf32>
    %13 = arith.maximumf %11, %12 : vector<16x32xf32>
    %cst_9 = arith.constant dense<0.000000e+00> : vector<32xf32>
    %14 = vector.multi_reduction <add>, %13, %cst_9 [0] : vector<16x32xf32> to vector<32xf32>
    %15 = vector.shape_cast %14 : vector<32xf32> to vector<1x32xf32>
    %cst_10 = arith.constant 1.600000e+01 : f32
    %16 = vector.broadcast %cst_10 : f32 to vector<1x32xf32>
    %17 = arith.divf %15, %16 : vector<1x32xf32>
    %18 = vector.broadcast %17 : vector<1x32xf32> to vector<16x32xf32>
    %19 = arith.subf %13, %18 : vector<16x32xf32>
    %20 = arith.mulf %19, %19 : vector<16x32xf32>
    %cst_11 = arith.constant dense<0.000000e+00> : vector<32xf32>
    %21 = vector.multi_reduction <add>, %20, %cst_11 [0] : vector<16x32xf32> to vector<32xf32>
    %22 = vector.shape_cast %21 : vector<32xf32> to vector<1x32xf32>
    %cst_12 = arith.constant 1.600000e+01 : f32
    %23 = vector.broadcast %cst_12 : f32 to vector<1x32xf32>
    %24 = arith.divf %22, %23 : vector<1x32xf32>
    %25 = vector.broadcast %17 : vector<1x32xf32> to vector<16x32xf32>
    %26 = arith.subf %13, %25 : vector<16x32xf32>
    %cst_13 = arith.constant 9.99999974E-6 : f32
    %27 = vector.broadcast %cst_13 : f32 to vector<1x32xf32>
    %28 = arith.addf %24, %27 : vector<1x32xf32>
    %29 = math.rsqrt %28 : vector<1x32xf32>
    %30 = vector.broadcast %29 : vector<1x32xf32> to vector<16x32xf32>
    %31 = arith.mulf %26, %30 : vector<16x32xf32>
    %32 = vector.broadcast %5 : vector<1x32xf32> to vector<16x32xf32>
    %33 = arith.mulf %31, %32 : vector<16x32xf32>
    %34 = vector.broadcast %6 : vector<1x32xf32> to vector<16x32xf32>
    %35 = arith.addf %33, %34 : vector<16x32xf32>
    %c0_14 = arith.constant 0 : index
    %c0_15 = arith.constant 0 : index
    %36 = vector.load %arg3[%c0_14, %c0_15] : memref<64x32xf32, #tpu.memory_space<vmem>>, vector<64x32xf32>
    %37 = vector.extract_strided_slice %2 {offsets = [3, 0], sizes = [1, 32], strides = [1, 1]} : vector<10x32xf32> to vector<1x32xf32>
    %38 = vector.extract_strided_slice %2 {offsets = [4, 0], sizes = [1, 32], strides = [1, 1]} : vector<10x32xf32> to vector<1x32xf32>
    %39 = vector.extract_strided_slice %2 {offsets = [5, 0], sizes = [1, 32], strides = [1, 1]} : vector<10x32xf32> to vector<1x32xf32>
    %cst_16 = arith.constant dense<0.000000e+00> : vector<16x32xf32>
    %40 = tpu.matmul %1, %35, %cst_16 {dimension_numbers = #tpu.dot_dimension_numbers<[1], [0], [0], [1], [0, 0, 1, 1], [], []>} : vector<16x16xf32>, vector<16x32xf32>, vector<16x32xf32> -> vector<16x32xf32>
    %41 = tpu.concatenate %40, %35 in 1 : vector<16x32xf32>, vector<16x32xf32> -> vector<16x64xf32>
    %cst_17 = arith.constant dense<0.000000e+00> : vector<16x32xf32>
    %42 = tpu.matmul %41, %36, %cst_17 {dimension_numbers = #tpu.dot_dimension_numbers<[1], [0], [0], [1], [0, 0, 1, 1], [], []>} : vector<16x64xf32>, vector<64x32xf32>, vector<16x32xf32> -> vector<16x32xf32>
    %43 = vector.broadcast %37 : vector<1x32xf32> to vector<16x32xf32>
    %44 = arith.addf %42, %43 : vector<16x32xf32>
    %cst_18 = arith.constant 0.000000e+00 : f32
    %45 = vector.broadcast %cst_18 : f32 to vector<16x32xf32>
    %46 = arith.maximumf %44, %45 : vector<16x32xf32>
    %cst_19 = arith.constant dense<0.000000e+00> : vector<32xf32>
    %47 = vector.multi_reduction <add>, %46, %cst_19 [0] : vector<16x32xf32> to vector<32xf32>
    %48 = vector.shape_cast %47 : vector<32xf32> to vector<1x32xf32>
    %cst_20 = arith.constant 1.600000e+01 : f32
    %49 = vector.broadcast %cst_20 : f32 to vector<1x32xf32>
    %50 = arith.divf %48, %49 : vector<1x32xf32>
    %51 = vector.broadcast %50 : vector<1x32xf32> to vector<16x32xf32>
    %52 = arith.subf %46, %51 : vector<16x32xf32>
    %53 = arith.mulf %52, %52 : vector<16x32xf32>
    %cst_21 = arith.constant dense<0.000000e+00> : vector<32xf32>
    %54 = vector.multi_reduction <add>, %53, %cst_21 [0] : vector<16x32xf32> to vector<32xf32>
    %55 = vector.shape_cast %54 : vector<32xf32> to vector<1x32xf32>
    %cst_22 = arith.constant 1.600000e+01 : f32
    %56 = vector.broadcast %cst_22 : f32 to vector<1x32xf32>
    %57 = arith.divf %55, %56 : vector<1x32xf32>
    %58 = vector.broadcast %50 : vector<1x32xf32> to vector<16x32xf32>
    %59 = arith.subf %46, %58 : vector<16x32xf32>
    %cst_23 = arith.constant 9.99999974E-6 : f32
    %60 = vector.broadcast %cst_23 : f32 to vector<1x32xf32>
    %61 = arith.addf %57, %60 : vector<1x32xf32>
    %62 = math.rsqrt %61 : vector<1x32xf32>
    %63 = vector.broadcast %62 : vector<1x32xf32> to vector<16x32xf32>
    %64 = arith.mulf %59, %63 : vector<16x32xf32>
    %65 = vector.broadcast %38 : vector<1x32xf32> to vector<16x32xf32>
    %66 = arith.mulf %64, %65 : vector<16x32xf32>
    %67 = vector.broadcast %39 : vector<1x32xf32> to vector<16x32xf32>
    %68 = arith.addf %66, %67 : vector<16x32xf32>
    %c0_24 = arith.constant 0 : index
    %c0_25 = arith.constant 0 : index
    %69 = vector.load %arg4[%c0_24, %c0_25] : memref<64x8xf32, #tpu.memory_space<vmem>>, vector<64x8xf32>
    %70 = vector.extract_strided_slice %2 {offsets = [6, 0], sizes = [1, 8], strides = [1, 1]} : vector<10x32xf32> to vector<1x8xf32>
    %71 = vector.extract_strided_slice %2 {offsets = [7, 0], sizes = [1, 8], strides = [1, 1]} : vector<10x32xf32> to vector<1x8xf32>
    %72 = vector.extract_strided_slice %2 {offsets = [8, 0], sizes = [1, 8], strides = [1, 1]} : vector<10x32xf32> to vector<1x8xf32>
    %cst_26 = arith.constant dense<0.000000e+00> : vector<16x32xf32>
    %73 = tpu.matmul %1, %68, %cst_26 {dimension_numbers = #tpu.dot_dimension_numbers<[1], [0], [0], [1], [0, 0, 1, 1], [], []>} : vector<16x16xf32>, vector<16x32xf32>, vector<16x32xf32> -> vector<16x32xf32>
    %74 = tpu.concatenate %73, %68 in 1 : vector<16x32xf32>, vector<16x32xf32> -> vector<16x64xf32>
    %cst_27 = arith.constant dense<0.000000e+00> : vector<16x8xf32>
    %75 = tpu.matmul %74, %69, %cst_27 {dimension_numbers = #tpu.dot_dimension_numbers<[1], [0], [0], [1], [0, 0, 1, 1], [], []>} : vector<16x64xf32>, vector<64x8xf32>, vector<16x8xf32> -> vector<16x8xf32>
    %76 = vector.broadcast %70 : vector<1x8xf32> to vector<16x8xf32>
    %77 = arith.addf %75, %76 : vector<16x8xf32>
    %cst_28 = arith.constant 0.000000e+00 : f32
    %78 = vector.broadcast %cst_28 : f32 to vector<16x8xf32>
    %79 = arith.maximumf %77, %78 : vector<16x8xf32>
    %cst_29 = arith.constant dense<0.000000e+00> : vector<8xf32>
    %80 = vector.multi_reduction <add>, %79, %cst_29 [0] : vector<16x8xf32> to vector<8xf32>
    %81 = vector.shape_cast %80 : vector<8xf32> to vector<1x8xf32>
    %cst_30 = arith.constant 1.600000e+01 : f32
    %82 = vector.broadcast %cst_30 : f32 to vector<1x8xf32>
    %83 = arith.divf %81, %82 : vector<1x8xf32>
    %84 = vector.broadcast %83 : vector<1x8xf32> to vector<16x8xf32>
    %85 = arith.subf %79, %84 : vector<16x8xf32>
    %86 = arith.mulf %85, %85 : vector<16x8xf32>
    %cst_31 = arith.constant dense<0.000000e+00> : vector<8xf32>
    %87 = vector.multi_reduction <add>, %86, %cst_31 [0] : vector<16x8xf32> to vector<8xf32>
    %88 = vector.shape_cast %87 : vector<8xf32> to vector<1x8xf32>
    %cst_32 = arith.constant 1.600000e+01 : f32
    %89 = vector.broadcast %cst_32 : f32 to vector<1x8xf32>
    %90 = arith.divf %88, %89 : vector<1x8xf32>
    %91 = vector.broadcast %83 : vector<1x8xf32> to vector<16x8xf32>
    %92 = arith.subf %79, %91 : vector<16x8xf32>
    %cst_33 = arith.constant 9.99999974E-6 : f32
    %93 = vector.broadcast %cst_33 : f32 to vector<1x8xf32>
    %94 = arith.addf %90, %93 : vector<1x8xf32>
    %95 = math.rsqrt %94 : vector<1x8xf32>
    %96 = vector.broadcast %95 : vector<1x8xf32> to vector<16x8xf32>
    %97 = arith.mulf %92, %96 : vector<16x8xf32>
    %98 = vector.broadcast %71 : vector<1x8xf32> to vector<16x8xf32>
    %99 = arith.mulf %97, %98 : vector<16x8xf32>
    %100 = vector.broadcast %72 : vector<1x8xf32> to vector<16x8xf32>
    %101 = arith.addf %99, %100 : vector<16x8xf32>
    %102 = tpu.concatenate %35, %68, %101 in 1 : vector<16x32xf32>, vector<16x32xf32>, vector<16x8xf32> -> vector<16x72xf32>
    %c0_34 = arith.constant 0 : index
    %c0_35 = arith.constant 0 : index
    %103 = vector.load %arg7[%c0_34, %c0_35] : memref<16x72xf32, #tpu.memory_space<vmem>>, vector<16x72xf32>
    tpu.vector_store %arg7[%c0_34, %c0_35], %102 {strides = array<i32>} : memref<16x72xf32, #tpu.memory_space<vmem>>, vector<16x72xf32>,
    %c0_36 = arith.constant 0 : index
    %c0_37 = arith.constant 0 : index
    %104 = vector.load %arg5[%c0_36, %c0_37] : memref<72x8xf32, #tpu.memory_space<vmem>>, vector<72x8xf32>
    %cst_38 = arith.constant dense<0.000000e+00> : vector<16x8xf32>
    %105 = tpu.matmul %102, %104, %cst_38 {dimension_numbers = #tpu.dot_dimension_numbers<[1], [0], [0], [1], [0, 0, 1, 1], [], []>} : vector<16x72xf32>, vector<72x8xf32>, vector<16x8xf32> -> vector<16x8xf32>
    %106 = vector.extract_strided_slice %2 {offsets = [9, 0], sizes = [1, 8], strides = [1, 1]} : vector<10x32xf32> to vector<1x8xf32>
    %107 = vector.broadcast %106 : vector<1x8xf32> to vector<16x8xf32>
    %108 = arith.addf %105, %107 : vector<16x8xf32>
    %cst_39 = arith.constant 0.000000e+00 : f32
    %109 = vector.broadcast %cst_39 : f32 to vector<16x8xf32>
    %110 = arith.maximumf %108, %109 : vector<16x8xf32>
    %cst_40 = arith.constant dense<0xFF800000> : vector<16xf32>
    %111 = vector.multi_reduction <maximumf>, %110, %cst_40 [1] : vector<16x8xf32> to vector<16xf32>
    %112 = vector.shape_cast %111 : vector<16xf32> to vector<16x1xf32>
    %113 = vector.broadcast %112 : vector<16x1xf32> to vector<16x8xf32>
    %114 = arith.subf %110, %113 : vector<16x8xf32>
    %115 = math.exp %114 : vector<16x8xf32>
    %cst_41 = arith.constant dense<0.000000e+00> : vector<16xf32>
    %116 = vector.multi_reduction <add>, %115, %cst_41 [1] : vector<16x8xf32> to vector<16xf32>
    %117 = vector.shape_cast %116 : vector<16xf32> to vector<16x1xf32>
    %118 = vector.broadcast %117 : vector<16x1xf32> to vector<16x8xf32>
    %119 = arith.divf %115, %118 : vector<16x8xf32>
    %c0_42 = arith.constant 0 : index
    %c0_43 = arith.constant 0 : index
    %120 = vector.load %arg8[%c0_42, %c0_43] : memref<16x8xf32, #tpu.memory_space<vmem>>, vector<16x8xf32>
    tpu.vector_store %arg8[%c0_42, %c0_43], %119 {strides = array<i32>} : memref<16x8xf32, #tpu.memory_space<vmem>>, vector<16x8xf32>,
    %cst_44 = arith.constant dense<0.000000e+00> : vector<16x16xf32>
    %121 = tpu.matmul %119, %119, %cst_44 {dimension_numbers = #tpu.dot_dimension_numbers<[1], [1], [0], [0], [0, 0, 1, 0], [], []>} : vector<16x8xf32>, vector<16x8xf32>, vector<16x16xf32> -> vector<16x16xf32>
    %122 = arith.subf %121, %1 : vector<16x16xf32>
    %123 = arith.mulf %122, %122 : vector<16x16xf32>
    %124 = vector.shape_cast %123 : vector<16x16xf32> to vector<1x16x16xf32>
    %cst_45 = arith.constant dense<0.000000e+00> : vector<1xf32>
    %125 = vector.multi_reduction <add>, %124, %cst_45 [1, 2] : vector<1x16x16xf32> to vector<1xf32>
    %126 = vector.shape_cast %125 : vector<1xf32> to vector<1x1x1xf32>
    %127 = vector.extract %126[0, 0, 0] : f32 from vector<1x1x1xf32>
    %128 = vector.broadcast %127 : f32 to vector<1x1xf32>
    %129 = math.sqrt %128 : vector<1x1xf32>
    %cst_46 = arith.constant dense<0xFF800000> : vector<16xf32>
    %130 = vector.multi_reduction <maximumf>, %119, %cst_46 [1] : vector<16x8xf32> to vector<16xf32>
    %131 = vector.shape_cast %130 : vector<16xf32> to vector<16x1xf32>
    %132 = vector.broadcast %131 : vector<16x1xf32> to vector<16x8xf32>
    %133 = arith.subf %119, %132 : vector<16x8xf32>
    %134 = math.exp %133 : vector<16x8xf32>
    %cst_47 = arith.constant dense<0.000000e+00> : vector<16xf32>
    %135 = vector.multi_reduction <add>, %134, %cst_47 [1] : vector<16x8xf32> to vector<16xf32>
    %136 = vector.shape_cast %135 : vector<16xf32> to vector<16x1xf32>
    %137 = vector.broadcast %136 : vector<16x1xf32> to vector<16x8xf32>
    %138 = arith.divf %134, %137 : vector<16x8xf32>
    %cst_48 = arith.constant 1.000000e-15 : f32
    %139 = vector.broadcast %cst_48 : f32 to vector<16x8xf32>
    %140 = arith.addf %138, %139 : vector<16x8xf32>
    %141 = math.log %140 : vector<16x8xf32>
    %142 = arith.mulf %138, %141 : vector<16x8xf32>
    %cst_49 = arith.constant dense<0.000000e+00> : vector<16xf32>
    %143 = vector.multi_reduction <add>, %142, %cst_49 [1] : vector<16x8xf32> to vector<16xf32>
    %144 = vector.shape_cast %143 : vector<16xf32> to vector<16x1xf32>
    %cst_50 = arith.constant 0.000000e+00 : f32
    %145 = vector.broadcast %cst_50 : f32 to vector<16x1xf32>
    %146 = arith.subf %145, %144 : vector<16x1xf32>
    %147 = vector.shape_cast %146 : vector<16x1xf32> to vector<1x16x1xf32>
    %cst_51 = arith.constant dense<0.000000e+00> : vector<1xf32>
    %148 = vector.multi_reduction <add>, %147, %cst_51 [1, 2] : vector<1x16x1xf32> to vector<1xf32>
    %149 = vector.shape_cast %148 : vector<1xf32> to vector<1x1x1xf32>
    %150 = vector.extract %149[0, 0, 0] : f32 from vector<1x1x1xf32>
    %151 = vector.broadcast %150 : f32 to vector<1x1xf32>
    %cst_52 = arith.constant 1.600000e+01 : f32
    %152 = vector.broadcast %cst_52 : f32 to vector<1x1xf32>
    %153 = arith.divf %151, %152 : vector<1x1xf32>
    %154 = arith.mulf %0, %0 : vector<16x8xf32>
    %cst_53 = arith.constant dense<0.000000e+00> : vector<16xf32>
    %155 = vector.multi_reduction <add>, %154, %cst_53 [1] : vector<16x8xf32> to vector<16xf32>
    %156 = vector.shape_cast %155 : vector<16xf32> to vector<16x1xf32>
    %157 = math.sqrt %156 : vector<16x1xf32>
    %cst_54 = arith.constant 9.99999993E-9 : f32
    %158 = vector.broadcast %cst_54 : f32 to vector<16x1xf32>
    %159 = arith.maximumf %157, %158 : vector<16x1xf32>
    %160 = vector.broadcast %159 : vector<16x1xf32> to vector<16x8xf32>
    %161 = arith.divf %0, %160 : vector<16x8xf32>
    %cst_55 = arith.constant dense<0.000000e+00> : vector<16x16xf32>
    %162 = tpu.matmul %161, %161, %cst_55 {dimension_numbers = #tpu.dot_dimension_numbers<[1], [1], [0], [0], [0, 0, 1, 0], [], []>} : vector<16x8xf32>, vector<16x8xf32>, vector<16x16xf32> -> vector<16x16xf32>
    %163 = arith.mulf %119, %119 : vector<16x8xf32>
    %cst_56 = arith.constant dense<0.000000e+00> : vector<16xf32>
    %164 = vector.multi_reduction <add>, %163, %cst_56 [1] : vector<16x8xf32> to vector<16xf32>
    %165 = vector.shape_cast %164 : vector<16xf32> to vector<16x1xf32>
    %166 = math.sqrt %165 : vector<16x1xf32>
    %cst_57 = arith.constant 9.99999993E-9 : f32
    %167 = vector.broadcast %cst_57 : f32 to vector<16x1xf32>
    %168 = arith.maximumf %166, %167 : vector<16x1xf32>
    %169 = vector.broadcast %168 : vector<16x1xf32> to vector<16x8xf32>
    %170 = arith.divf %119, %169 : vector<16x8xf32>
    %cst_58 = arith.constant dense<0.000000e+00> : vector<16x16xf32>
    %171 = tpu.matmul %170, %170, %cst_58 {dimension_numbers = #tpu.dot_dimension_numbers<[1], [1], [0], [0], [0, 0, 1, 0], [], []>} : vector<16x8xf32>, vector<16x8xf32>, vector<16x16xf32> -> vector<16x16xf32>
    %172 = arith.mulf %162, %162 : vector<16x16xf32>
    %cst_59 = arith.constant dense<0.000000e+00> : vector<16xf32>
    %173 = vector.multi_reduction <add>, %172, %cst_59 [1] : vector<16x16xf32> to vector<16xf32>
    %174 = vector.shape_cast %173 : vector<16xf32> to vector<16x1xf32>
    %175 = math.sqrt %174 : vector<16x1xf32>
    %cst_60 = arith.constant 9.99999993E-9 : f32
    %176 = vector.broadcast %cst_60 : f32 to vector<16x1xf32>
    %177 = arith.maximumf %175, %176 : vector<16x1xf32>
    %178 = vector.broadcast %177 : vector<16x1xf32> to vector<16x16xf32>
    %179 = arith.divf %162, %178 : vector<16x16xf32>
    %180 = arith.mulf %171, %171 : vector<16x16xf32>
    %cst_61 = arith.constant dense<0.000000e+00> : vector<16xf32>
    %181 = vector.multi_reduction <add>, %180, %cst_61 [1] : vector<16x16xf32> to vector<16xf32>
    %182 = vector.shape_cast %181 : vector<16xf32> to vector<16x1xf32>
    %183 = math.sqrt %182 : vector<16x1xf32>
    %cst_62 = arith.constant 9.99999993E-9 : f32
    %184 = vector.broadcast %cst_62 : f32 to vector<16x1xf32>
    %185 = arith.maximumf %183, %184 : vector<16x1xf32>
    %186 = vector.broadcast %185 : vector<16x1xf32> to vector<16x16xf32>
    %187 = arith.divf %171, %186 : vector<16x16xf32>
    %188 = arith.mulf %179, %187 : vector<16x16xf32>
    %189 = vector.shape_cast %188 : vector<16x16xf32> to vector<1x16x16xf32>
    %cst_63 = arith.constant dense<0.000000e+00> : vector<1xf32>
    %190 = vector.multi_reduction <add>, %189, %cst_63 [1, 2] : vector<1x16x16xf32> to vector<1xf32>
    %191 = vector.shape_cast %190 : vector<1xf32> to vector<1x1x1xf32>
    %192 = vector.extract %191[0, 0, 0] : f32 from vector<1x1x1xf32>
    %193 = vector.broadcast %192 : f32 to vector<1x1xf32>
    %cst_64 = arith.constant 0.000000e+00 : f32
    %194 = vector.broadcast %cst_64 : f32 to vector<1x1xf32>
    %195 = arith.subf %194, %193 : vector<1x1xf32>
    %cst_65 = arith.constant 1.600000e+01 : f32
    %196 = vector.broadcast %cst_65 : f32 to vector<1x1xf32>
    %197 = arith.divf %195, %196 : vector<1x1xf32>
    %198 = tpu.iota {dimensions = array<i32: 1>} : vector<1x128xi32>
    %c0_i32 = arith.constant 0 : i32
    %199 = vector.broadcast %c0_i32 : i32 to vector<1x128xi32>
    %200 = arith.cmpi eq, %198, %199 : vector<1x128xi32>
    %c1_i32 = arith.constant 1 : i32
    %201 = vector.broadcast %c1_i32 : i32 to vector<1x128xi32>
    %202 = arith.cmpi eq, %198, %201 : vector<1x128xi32>
    %c2_i32 = arith.constant 2 : i32
    %203 = vector.broadcast %c2_i32 : i32 to vector<1x128xi32>
    %204 = arith.cmpi eq, %198, %203 : vector<1x128xi32>
    %cst_66 = arith.constant 0.000000e+00 : f32
    %205 = vector.shape_cast %197 : vector<1x1xf32> to vector<1x1xf32>
    %206 = vector.broadcast %205 : vector<1x1xf32> to vector<1x128xf32>
    %207 = vector.broadcast %cst_66 : f32 to vector<1x128xf32>
    %208 = arith.select %204, %206, %207 : vector<1x128xi1>, vector<1x128xf32>
    %209 = vector.shape_cast %153 : vector<1x1xf32> to vector<1x1xf32>
    %210 = vector.broadcast %209 : vector<1x1xf32> to vector<1x128xf32>
    %211 = arith.select %202, %210, %208 : vector<1x128xi1>, vector<1x128xf32>
    %212 = vector.shape_cast %129 : vector<1x1xf32> to vector<1x1xf32>
    %213 = vector.broadcast %212 : vector<1x1xf32> to vector<1x128xf32>
    %214 = arith.select %200, %213, %211 : vector<1x128xi1>, vector<1x128xf32>
    %c0_67 = arith.constant 0 : index
    %c0_68 = arith.constant 0 : index
    %215 = vector.load %arg9[%c0_67, %c0_68] : memref<1x128xf32, #tpu.memory_space<vmem>>, vector<1x128xf32>
    tpu.vector_store %arg9[%c0_67, %c0_68], %214 {strides = array<i32>} : memref<1x128xf32, #tpu.memory_space<vmem>>, vector<1x128xf32>,
    return
  }
}

</mosaic_0001>

<bundles_post_ra>
// kernel: tpu_custom_call.1
= control target key start
LH: loop header
LB: loop body
LE: loop exit
PB: predicated region body
PF: predicated region fallthrough
CT: control target
= control target key end

     0   :  { %15 = vsyncpa [#allocation3], 0  ;;  %vm39_vm0 = vcmask 130048   ;;  %s1579_s0 = inlined_call_operand.vmem [shape: f32[16,8], index: 0, kind: input, shape index: {}]   ;;  %s1580_s1 = inlined_call_operand.vmem [shape: f32[16,16], index: 1, kind: input, shape index: {}]   ;;  %s1581_s2 = inlined_call_operand.vmem [shape: f32[16,32], index: 2, kind: input, shape index: {}]   ;;  %s1582_s3 = inlined_call_operand.vmem [shape: f32[64,32], index: 3, kind: input, shape index: {}]   ;;  %s1583_s4 = inlined_call_operand.vmem [shape: f32[64,8], index: 4, kind: input, shape index: {}]   ;;  %s1584_s5 = inlined_call_operand.vmem [shape: f32[72,8], index: 5, kind: input, shape index: {}]   ;;  %s1585_s6 = inlined_call_operand.vmem [shape: f32[10,32], index: 6, kind: input, shape index: {}]   ;;  %s1586_s7 = inlined_call_operand.hbm [shape: f32[16,72], index: 7, kind: output, shape index: {0}]   ;;  %s1587_s8 = inlined_call_operand.vmem [shape: f32[16,8], index: 8, kind: output, shape index: {1}]   ;;  %s1588_s9 = inlined_call_operand.hbm [shape: f32[1,128], index: 9, kind: output, shape index: {2}]  }
   0x1   :  { %v1234_v0 = vld [vmem:[%s1579_s0 + $0x8] sm:$0xff]  ;;  %v1239_v1 = vld [vmem:[%s1579_s0] sm:$0xff] }
   0x2   :  { %v1244_v2 = vld [vmem:[%s1580_s1] sm:$0xff]  ;;  %60 = vmatpush.msra.mxu0 %v1234_v0  ;;  %1043 = vmatpush.msra.mxu2 %v1234_v0  ;;  %v1251_v3 = vld [vmem:[%s1580_s1 + $0x8] sm:$0xff] }
   0x3   :  { %v38_v4 = vld [vmem:[%s1581_s2 + $0x8] sm:$0xff] }
   0x4   :  { %16 = vsyncpa [#allocation5], 0  ;;  %s1174_s0 = smov 8   ;;  %101 = vmatpush.msra.mxu1 %v38_v4  ;;  %61 = vmatpush.msra.mxu0 %v1239_v1  ;;  %v37_v5 = vld [vmem:[%s1581_s2] sm:$0xff]  ;;  %vm77_vm1 = vcmask 64512   ;;  %v1175_v14 = vmov 16.0  }
   0x5   :  { %71 = vrot.lane.b32.xlu0 %v1239_v1, %s1174_s0  ;;  %1044 = vmatpush.msra.mxu2 %v1239_v1  ;;  %v1276_v12 = vld [vmem:[%s1585_s6] sm:$0xff]  ;;  %1058 = vrcp.f32 %v1175_v14  ;;  %vm112_vm2 = vcmask 261120   ;;  %s1176_s2 = smov 32   ;;  %v164_v14 = vld [vmem:[%s1582_s3 + $0x8] sm:$0xff]  ;;  %vm205_vm7 = vcmask 523264   ;;  %s1177_s26 = smov 64  }
   0x6   :  { %1017 = vmatmul.msk.f32.vlgmr.msra.gmra.mxu0 %vm39_vm0, %v1244_v2  ;;  %1018 = vmatmul.msk.f32.vlgmr.msra.gmra.mxu2 %vm39_vm0, %v1251_v3  ;;  %v80_v15 = vperm.slane %v1276_v12, 0  ;;  %v157_v58 = vperm.slane %v1276_v12, 1  ;;  %v160_v62 = vperm.slane %v1276_v12, 2  ;;  %vm408_vm14 = vcmask 588800   ;;  %s985_s13 = sshll.u32 %s1586_s7, 4  ;;  %s1178_s14 = smov [#allocation2]   ;;  %s986_s13 = int_to_ptr.hbm [resolvable:$true] %s985_s13 }
   0x7   :  { %102 = vmatpush.msra.mxu1 %v37_v5  ;;  %s983_s15 = sshll.u32 %s1178_s14, 4  ;;  %s1179_s16 = smov 128   ;;  %s984_s15 = int_to_ptr.vmem [resolvable:$true] %s983_s15 }
   0x8   :  { %s1001_s21 = sshll.u32 %s1588_s9, 4  ;;  %s1002_s21 = int_to_ptr.hbm [resolvable:$true] %s1001_s21 }
   0xb   :  { %v1059_v17 = vpop.eup %1058 }
   0xc   :  { %v123_v21 = vmul.f32 16.0, %v1059_v17  ;;  %vm127_vm3 = vweird.f32 %v1059_v17 }
   0xd   :  { %73 = vrot.lane.b32.xlu0 %v1234_v0, %s1174_s0 }
   0xe   :  { %v124_v25 = vsub.f32 1.0, %v123_v21 }
  0x10   :  { %v125_v28 = vmul.f32 %v1059_v17, %v124_v25 }
  0x12   :  { %v126_v31 = vadd.f32 %v1059_v17, %v125_v28 }
  0x14   :  { %v1281_v34 = vsel %vm127_vm3, %v1059_v17, %v126_v31 }
  0x77   :  { %v72_v6 = vpop.permute.xlu0 %71 }
  0x7f   :  { %v74_v9 = vpop.permute.xlu0 %73 }
  0x83   :  { %v63_v7 = vpop.f32.mrf.mxu0 }
  0x84   :  { %v78_v8 = vsel %vm77_vm1, %v63_v7, %v72_v6  ;;  %v170_v7 = vld [vmem:[%s1582_s3 + $0x38] sm:$0xff] }
  0x85   :  { %1019 = vmatmul.msk.f32.vlgmr.msra.gmra.mxu1 %vm39_vm0, %v78_v8  ;;  %220 = vmatpush.msra.mxu3 %v170_v7  ;;  %v169_v8 = vld [vmem:[%s1582_s3 + $0x30] sm:$0xff] }
  0x87   :  { %221 = vmatpush.msra.mxu3 %v169_v8 }
  0x89   :  { %v66_v10 = vpop.f32.mrf.mxu2 }
  0x8a   :  { %v79_v11 = vsel %vm77_vm1, %v66_v10, %v74_v9  ;;  %v168_v9 = vld [vmem:[%s1582_s3 + $0x28] sm:$0xff]  ;;  %v167_v10 = vld [vmem:[%s1582_s3 + $0x20] sm:$0xff] }
  0x8b   :  { %222 = vmatpush.msra.mxu3 %v168_v9 }
  0x8d   :  { %1020 = vmatmul.msk.f32.gmra.mxu1 %vm39_vm0, %v79_v11  ;;  %v166_v11 = vld [vmem:[%s1582_s3 + $0x18] sm:$0xff]  ;;  %223 = vmatpush.msra.mxu3 %v167_v10 }
  0x8f   :  { %224 = vmatpush.msra.mxu3 %v166_v11 }
 0x102   :  { %v104_v13 = vpop.f32.mrf.mxu1 }
 0x103   :  { %v105_v16 = vadd.f32 %v104_v13, %v80_v15  ;;  %v165_v13 = vld [vmem:[%s1582_s3 + $0x10] sm:$0xff] }
 0x104   :  { %225 = vmatpush.msra.mxu3 %v165_v13  ;;  %v287_v13 = vld [vmem:[%s1583_s4 + $0x38] sm:$0xff] }
 0x105   :  { %v110_v19 = vmax.f32 %v105_v16, 0.0  ;;  %336 = vmatpush.msrb.mxu1 %v287_v13 }
 0x106   :  { %226 = vmatpush.msra.mxu3 %v164_v14  ;;  %v286_v14 = vld [vmem:[%s1583_s4 + $0x30] sm:$0xff] }
 0x107   :  { %v113_v23 = vsel %vm112_vm2, %v110_v19, 0.0  ;;  %337 = vmatpush.msrb.mxu1 %v286_v14 }
 0x10a   :  { %v107_v18 = vpop.f32.mrf.mxu1 }
 0x10b   :  { %v108_v20 = vadd.f32 %v107_v18, %v80_v15  ;;  %v163_v15 = vld [vmem:[%s1582_s3] sm:$0xff]  ;;  %s1180_s3 = smov [#allocation4]  }
 0x10c   :  { %227 = vmatpush.msra.mxu3 %v163_v15  ;;  %v285_v15 = vld [vmem:[%s1583_s4 + $0x28] sm:$0xff]  ;;  %s999_s18 = sshll.u32 %s1180_s3, 4  ;;  %s1000_s18 = int_to_ptr.vmem [resolvable:$true] %s999_s18 }
 0x10d   :  { %v111_v22 = vmax.f32 %v108_v20, 0.0  ;;  %338 = vmatpush.msrb.mxu1 %v285_v15  ;;  %v36_v15 = vld [vmem:[%s1585_s6 + $0x8] sm:$0x3] }
 0x10f   :  { %v114_v24 = vsel %vm112_vm2, %v111_v22, 0.0 }
 0x110   :  { %v115_v26 = vadd.f32 %v114_v24, %v113_v23  ;;  %v204_v23 = vperm.slane %v1276_v12, 3 }
 0x112   :  { %v116_v27 = vrot.slane %v115_v26, 4 }
 0x114   :  { %v117_v29 = vadd.f32 %v116_v27, %v115_v26 }
 0x116   :  { %v118_v30 = vrot.slane %v117_v29, 2 }
 0x118   :  { %v119_v32 = vadd.f32 %v118_v30, %v117_v29 }
 0x11a   :  { %v120_v33 = vrot.slane %v119_v32, 1 }
 0x11c   :  { %v121_v35 = vadd.f32 %v120_v33, %v119_v32 }
 0x11e   :  { %v129_v36 = vmul.f32 %v1281_v34, %v121_v35 }
 0x120   :  { %v130_v37 = vsub.f32 %v110_v19, %v129_v36  ;;  %v131_v38 = vsub.f32 %v111_v22, %v129_v36 }
 0x122   :  { %v132_v39 = vmul.f32 %v130_v37, %v130_v37  ;;  %v133_v40 = vmul.f32 %v131_v38, %v131_v38 }
 0x124   :  { %v134_v41 = vsel %vm112_vm2, %v132_v39, 0.0  ;;  %v135_v42 = vsel %vm112_vm2, %v133_v40, 0.0 }
 0x125   :  { %v136_v43 = vadd.f32 %v135_v42, %v134_v41 }
 0x127   :  { %v137_v44 = vrot.slane %v136_v43, 4 }
 0x129   :  { %v138_v45 = vadd.f32 %v137_v44, %v136_v43 }
 0x12b   :  { %v139_v46 = vrot.slane %v138_v45, 2 }
 0x12d   :  { %v140_v47 = vadd.f32 %v139_v46, %v138_v45 }
 0x12f   :  { %v141_v48 = vrot.slane %v140_v47, 1 }
 0x131   :  { %v142_v49 = vadd.f32 %v141_v48, %v140_v47 }
 0x133   :  { %v143_v50 = vmul.f32 %v142_v49, %v1281_v34 }
 0x135   :  { %v144_v51 = vadd.f32 1e-05, %v143_v50 }
 0x137   :  { %1060 = vrsqrt.f32 %v144_v51  ;;  %vm151_vm5 = vweird.f32 %v144_v51 }
 0x13d   :  { %v1061_v52 = vpop.eup %1060 }
 0x13e   :  { %v146_v53 = vmul.f32 %v1061_v52, %v144_v51  ;;  %vm152_vm4 = vweird.f32 %v1061_v52 }
 0x13f   :  { %vm153_vm6 = vmor %vm151_vm5, %vm152_vm4 }
 0x140   :  { %v147_v54 = vmul.f32 %v1061_v52, %v146_v53 }
 0x142   :  { %v148_v55 = vmul.f32 0.5, %v147_v54 }
 0x144   :  { %v149_v56 = vsub.f32 1.5, %v148_v55 }
 0x146   :  { %v150_v57 = vmul.f32 %v1061_v52, %v149_v56 }
 0x148   :  { %v154_v59 = vsel %vm153_vm6, %v1061_v52, %v150_v57 }
 0x149   :  { %v155_v60 = vmul.f32 %v154_v59, %v130_v37  ;;  %v156_v61 = vmul.f32 %v154_v59, %v131_v38 }
 0x14b   :  { %v159_v63 = vmul.f32 %v157_v58, %v156_v61  ;;  %v158_v4 = vmul.f32 %v157_v58, %v155_v60  ;;  %v274_v61 = vperm.slane %v1276_v12, 4 }
 0x14d   :  { %v1289_v5 = vadd.f32 %v160_v62, %v159_v63  ;;  %v1291_v6 = vadd.f32 %v160_v62, %v158_v4  ;;  %v277_v4 = vperm.slane %v1276_v12, 5 }
 0x14f   :  { %185 = vmatpush.msrb.mxu2 %v1289_v5  ;;  %196 = vrot.lane.b32.xlu1 %v1291_v6, %s1176_s2 }
 0x151   :  { %186 = vmatpush.msrb.mxu2 %v1291_v6 }
 0x152   :  { %1021 = vmatmul.msk.f32.vlgmr.msrb.gmra.mxu2 %vm39_vm0, %v1244_v2 }
 0x157   :  { %198 = vrot.lane.b32.xlu1 %v1289_v5, %s1176_s2 }
 0x15a   :  { %1022 = vmatmul.msk.f32.gmra.mxu2 %vm39_vm0, %v1251_v3 }
 0x1c1   :  { %v197_v16 = vpop.permute.xlu1 %196 }
 0x1c9   :  { %v199_v19 = vpop.permute.xlu1 %198 }
 0x1d5   :  { %v188_v17 = vpop.f32.mrf.mxu2 }
 0x1d6   :  { %v202_v18 = vsel %vm112_vm2, %v188_v17, %v197_v16  ;;  %v282_v16 = vld [vmem:[%s1583_s4 + $0x10] sm:$0xff]  ;;  %v281_v17 = vld [vmem:[%s1583_s4 + $0x8] sm:$0xff] }
 0x1d7   :  { %1023 = vmatmul.msk.f32.vlgmr.msra.gmra.mxu3 %vm205_vm7, %v202_v18  ;;  %v280_v18 = vld [vmem:[%s1583_s4] sm:$0xff] }
 0x1dd   :  { %v191_v20 = vpop.f32.mrf.mxu2 }
 0x1de   :  { %v203_v21 = vsel %vm112_vm2, %v191_v20, %v199_v19 }
 0x1df   :  { %1024 = vmatmul.msk.f32.gmra.mxu3 %vm205_vm7, %v203_v21 }
 0x25a   :  { %v229_v22 = vpop.f32.mrf.mxu3 }
 0x25b   :  { %v230_v24 = vadd.f32 %v229_v22, %v204_v23 }
 0x25d   :  { %v235_v26 = vmax.f32 %v230_v24, 0.0 }
 0x25f   :  { %v237_v29 = vsel %vm112_vm2, %v235_v26, 0.0 }
 0x262   :  { %v232_v25 = vpop.f32.mrf.mxu3 }
 0x263   :  { %v233_v27 = vadd.f32 %v232_v25, %v204_v23 }
 0x265   :  { %v236_v28 = vmax.f32 %v233_v27, 0.0 }
 0x267   :  { %v238_v30 = vsel %vm112_vm2, %v236_v28, 0.0 }
 0x268   :  { %v239_v31 = vadd.f32 %v238_v30, %v237_v29 }
 0x26a   :  { %v240_v32 = vrot.slane %v239_v31, 4 }
 0x26c   :  { %v241_v33 = vadd.f32 %v240_v32, %v239_v31 }
 0x26e   :  { %v242_v35 = vrot.slane %v241_v33, 2 }
 0x270   :  { %v243_v36 = vadd.f32 %v242_v35, %v241_v33 }
 0x272   :  { %v244_v37 = vrot.slane %v243_v36, 1 }
 0x274   :  { %v245_v38 = vadd.f32 %v244_v37, %v243_v36 }
 0x276   :  { %v246_v39 = vmul.f32 %v245_v38, %v1281_v34 }
 0x278   :  { %v247_v40 = vsub.f32 %v235_v26, %v246_v39  ;;  %v248_v41 = vsub.f32 %v236_v28, %v246_v39  ;;  %v321_v26 = vperm.slane %v1276_v12, 6 }
 0x27a   :  { %v249_v42 = vmul.f32 %v247_v40, %v247_v40  ;;  %v250_v43 = vmul.f32 %v248_v41, %v248_v41 }
 0x27c   :  { %v251_v44 = vsel %vm112_vm2, %v249_v42, 0.0  ;;  %v252_v45 = vsel %vm112_vm2, %v250_v43, 0.0 }
 0x27d   :  { %v253_v46 = vadd.f32 %v252_v45, %v251_v44 }
 0x27f   :  { %v254_v47 = vrot.slane %v253_v46, 4 }
 0x281   :  { %v255_v48 = vadd.f32 %v254_v47, %v253_v46 }
 0x283   :  { %v256_v49 = vrot.slane %v255_v48, 2 }
 0x285   :  { %v257_v50 = vadd.f32 %v256_v49, %v255_v48 }
 0x287   :  { %v258_v51 = vrot.slane %v257_v50, 1 }
 0x289   :  { %v259_v52 = vadd.f32 %v258_v51, %v257_v50 }
 0x28b   :  { %v260_v53 = vmul.f32 %v259_v52, %v1281_v34 }
 0x28d   :  { %v261_v54 = vadd.f32 1e-05, %v260_v53 }
 0x28f   :  { %1062 = vrsqrt.f32 %v261_v54  ;;  %vm268_vm9 = vweird.f32 %v261_v54 }
 0x295   :  { %v1063_v55 = vpop.eup %1062 }
 0x296   :  { %v263_v56 = vmul.f32 %v1063_v55, %v261_v54  ;;  %vm269_vm8 = vweird.f32 %v1063_v55 }
 0x297   :  { %vm270_vm10 = vmor %vm268_vm9, %vm269_vm8 }
 0x298   :  { %v264_v57 = vmul.f32 %v1063_v55, %v263_v56  ;;  %v418_v56 = vld [vmem:[%s1584_s5 + $0x38] sm:$0xff] }
 0x29a   :  { %v265_v58 = vmul.f32 0.5, %v264_v57 }
 0x29c   :  { %v266_v59 = vsub.f32 1.5, %v265_v58  ;;  %v417_v58 = vld [vmem:[%s1584_s5 + $0x30] sm:$0xff] }
 0x29e   :  { %v267_v60 = vmul.f32 %v1063_v55, %v266_v59 }
 0x2a0   :  { %v271_v62 = vsel %vm270_vm10, %v1063_v55, %v267_v60  ;;  %v419_v55 = vld [vmem:[%s1584_s5 + $0x40] sm:$0xff]  ;;  %v416_v60 = vld [vmem:[%s1584_s5 + $0x28] sm:$0xff] }
 0x2a1   :  { %v273_v63 = vmul.f32 %v271_v62, %v248_v41  ;;  %v272_v7 = vmul.f32 %v271_v62, %v247_v40  ;;  %434 = vmatpush.msra.mxu2 %v419_v55  ;;  %v415_v62 = vld [vmem:[%s1584_s5 + $0x20] sm:$0xff] }
 0x2a3   :  { %v276_v8 = vmul.f32 %v274_v61, %v273_v63  ;;  %v275_v9 = vmul.f32 %v274_v61, %v272_v7  ;;  %435 = vmatpush.msra.mxu2 %v418_v56  ;;  %v414_v63 = vld [vmem:[%s1584_s5 + $0x18] sm:$0xff]  ;;  %v412_v7 = vld [vmem:[%s1584_s5 + $0x8] sm:$0xff] }
 0x2a5   :  { %v279_v10 = vadd.f32 %v277_v4, %v276_v8  ;;  %v278_v11 = vadd.f32 %v277_v4, %v275_v9  ;;  %436 = vmatpush.msra.mxu2 %v417_v58  ;;  %v413_v4 = vld [vmem:[%s1584_s5 + $0x10] sm:$0xff] }
 0x2a7   :  { %302 = vmatpush.msrb.mxu0 %v279_v10  ;;  %313 = vrot.lane.b32.xlu2 %v278_v11, %s1176_s2 }
 0x2a8   :  { %437 = vmatpush.msra.mxu2 %v416_v60 }
 0x2a9   :  { %303 = vmatpush.msrb.mxu0 %v278_v11 }
 0x2aa   :  { %1025 = vmatmul.msk.f32.vlgmr.msrb.gmra.mxu0 %vm39_vm0, %v1244_v2  ;;  %v284_v2 = vld [vmem:[%s1583_s4 + $0x20] sm:$0xff]  ;;  %438 = vmatpush.msra.mxu2 %v415_v62 }
 0x2ab   :  { %339 = vmatpush.msrb.mxu1 %v284_v2  ;;  %v390_v2 = vperm.slane %v1276_v12, 7 }
 0x2ac   :  { %439 = vmatpush.msra.mxu2 %v414_v63 }
 0x2ae   :  { %440 = vmatpush.msra.mxu2 %v413_v4 }
 0x2af   :  { %315 = vrot.lane.b32.xlu2 %v279_v10, %s1176_s2 }
 0x2b0   :  { %441 = vmatpush.msra.mxu2 %v412_v7 }
 0x2b2   :  { %1026 = vmatmul.msk.f32.gmra.mxu0 %vm39_vm0, %v1251_v3  ;;  %v283_v3 = vld [vmem:[%s1583_s4 + $0x18] sm:$0xff] }
 0x2b3   :  { %340 = vmatpush.msrb.mxu1 %v283_v3 }
 0x2b5   :  { %341 = vmatpush.msrb.mxu1 %v282_v16 }
 0x2b7   :  { %342 = vmatpush.msrb.mxu1 %v281_v17 }
 0x2b9   :  { %343 = vmatpush.msrb.mxu1 %v280_v18  ;;  %v393_v18 = vperm.slane %v36_v15, 0 }
 0x301   :  { %v1370_v19 = vpop.permute.xlu2 %313 }
 0x302   :  { %v404_v12 = vsel %vm112_vm2, %v1291_v6, %v1370_v19 }
 0x309   :  { %v1375_v22 = vpop.permute.xlu2 %315 }
 0x327   :  { %v305_v20 = vpop.f32.mrf.mxu0 }
 0x328   :  { %v319_v21 = vsel %vm112_vm2, %v305_v20, %v1370_v19 }
 0x329   :  { %1027 = vmatmul.msk.f32.vlgmr.msrb.gmra.mxu1 %vm205_vm7, %v319_v21 }
 0x32f   :  { %v308_v23 = vpop.f32.mrf.mxu0 }
 0x330   :  { %v320_v24 = vsel %vm112_vm2, %v308_v23, %v1375_v22 }
 0x331   :  { %1028 = vmatmul.msk.f32.gmra.mxu1 %vm205_vm7, %v320_v24 }
 0x3a6   :  { %v345_v25 = vpop.f32.mrf.mxu1 }
 0x3a7   :  { %v346_v27 = vadd.f32 %v345_v25, %v321_v26  ;;  %v411_v25 = vld [vmem:[%s1584_s5] sm:$0xff] }
 0x3a8   :  { %442 = vmatpush.msra.mxu2 %v411_v25 }
 0x3a9   :  { %v351_v29 = vmax.f32 %v346_v27, 0.0 }
 0x3ab   :  { %v353_v32 = vsel %vm77_vm1, %v351_v29, 0.0 }
 0x3ae   :  { %v348_v28 = vpop.f32.mrf.mxu1 }
 0x3af   :  { %v349_v30 = vadd.f32 %v348_v28, %v321_v26  ;;  %v405_v26 = vsel %vm112_vm2, %v1289_v5, %v1375_v22 }
 0x3b1   :  { %v352_v31 = vmax.f32 %v349_v30, 0.0 }
 0x3b3   :  { %v354_v33 = vsel %vm77_vm1, %v352_v31, 0.0 }
 0x3b4   :  { %v355_v35 = vadd.f32 %v354_v33, %v353_v32 }
 0x3b6   :  { %v356_v36 = vrot.slane %v355_v35, 4 }
 0x3b8   :  { %v357_v37 = vadd.f32 %v356_v36, %v355_v35 }
 0x3ba   :  { %v358_v38 = vrot.slane %v357_v37, 2 }
 0x3bc   :  { %v359_v39 = vadd.f32 %v358_v38, %v357_v37 }
 0x3be   :  { %v360_v40 = vrot.slane %v359_v39, 1 }
 0x3c0   :  { %v361_v41 = vadd.f32 %v360_v40, %v359_v39 }
 0x3c2   :  { %v362_v42 = vmul.f32 %v361_v41, %v1281_v34 }
 0x3c4   :  { %v363_v43 = vsub.f32 %v351_v29, %v362_v42  ;;  %v364_v44 = vsub.f32 %v352_v31, %v362_v42  ;;  %v420_v31 = vperm.slane %v36_v15, 1 }
 0x3c6   :  { %v365_v45 = vmul.f32 %v363_v43, %v363_v43  ;;  %v366_v46 = vmul.f32 %v364_v44, %v364_v44 }
 0x3c8   :  { %v367_v47 = vsel %vm77_vm1, %v365_v45, 0.0  ;;  %v368_v48 = vsel %vm77_vm1, %v366_v46, 0.0  ;;  %v640_v45 = vmul.f32 %v1234_v0, %v1234_v0 }
 0x3c9   :  { %v369_v49 = vadd.f32 %v368_v48, %v367_v47 }
 0x3ca   :  { %v644_v46 = vsel %vm77_vm1, %v640_v45, 0.0 }
 0x3cb   :  { %v370_v50 = vrot.slane %v369_v49, 4 }
 0x3cd   :  { %v371_v51 = vadd.f32 %v370_v50, %v369_v49  ;;  %v639_v49 = vmul.f32 %v1239_v1, %v1239_v1 }
 0x3cf   :  { %v372_v52 = vrot.slane %v371_v51, 2  ;;  %v641_v50 = vsel %vm77_vm1, %v639_v49, 0.0 }
 0x3d1   :  { %v373_v53 = vadd.f32 %v372_v52, %v371_v51 }
 0x3d3   :  { %v374_v54 = vrot.slane %v373_v53, 1 }
 0x3d5   :  { %v375_v57 = vadd.f32 %v374_v54, %v373_v53 }
 0x3d7   :  { %v376_v59 = vmul.f32 %v375_v57, %v1281_v34 }
 0x3d9   :  { %v377_v61 = vadd.f32 1e-05, %v376_v59 }
 0x3db   :  { %1064 = vrsqrt.f32 %v377_v61  ;;  %vm384_vm12 = vweird.f32 %v377_v61 }
 0x3e1   :  { %v1065_v8 = vpop.eup %1064 }
 0x3e2   :  { %v379_v9 = vmul.f32 %v1065_v8, %v377_v61  ;;  %vm385_vm11 = vweird.f32 %v1065_v8 }
 0x3e3   :  { %vm386_vm13 = vmor %vm384_vm12, %vm385_vm11 }
 0x3e4   :  { %v380_v10 = vmul.f32 %v1065_v8, %v379_v9 }
 0x3e6   :  { %v381_v11 = vmul.f32 0.5, %v380_v10 }
 0x3e8   :  { %v382_v13 = vsub.f32 1.5, %v381_v11 }
 0x3ea   :  { %v383_v14 = vmul.f32 %v1065_v8, %v382_v13 }
 0x3ec   :  { %v387_v3 = vsel %vm386_vm13, %v1065_v8, %v383_v14 }
 0x3ed   :  { %v388_v16 = vmul.f32 %v387_v3, %v363_v43  ;;  %v389_v17 = vmul.f32 %v387_v3, %v364_v44 }
 0x3ef   :  { %v392_v20 = vmul.f32 %v390_v2, %v389_v17  ;;  %v391_v21 = vmul.f32 %v390_v2, %v388_v16 }
 0x3f1   :  { %v395_v23 = vadd.f32 %v393_v18, %v392_v20  ;;  %v394_v24 = vadd.f32 %v393_v18, %v391_v21 }
 0x3f3   :  { %400 = vrot.lane.b32.xlu1 %v395_v23, %s1177_s26  ;;  %398 = vrot.lane.b32.xlu0 %v394_v24, %s1177_s26 }
 0x465   :  { %v401_v27 = vpop.permute.xlu1 %400  ;;  %v399_v28 = vpop.permute.xlu0 %398 }
 0x466   :  { %v406_v29 = vsel %vm205_vm7, %v404_v12, %v399_v28  ;;  %v407_v30 = vsel %vm205_vm7, %v405_v26, %v401_v27 }
 0x467   :  { %409 = vst.msk [vmem:[#allocation2] sm:$0xff] %vm408_vm14, %v406_v29  ;;  %1029 = vmatmul.msk.f32.vlgmr.msra.gmra.mxu2 %vm408_vm14, %v406_v29 }
 0x468   :  { %410 = vst.msk [vmem:[#allocation2 + $0x8] sm:$0xff] %vm408_vm14, %v407_v30 }
 0x469   :  { %991 = dma.vmem_to_hbm [thread:$0]  %s984_s15, 256, %s986_s13, [#allocation3], %s1179_s16, %s1179_s16, %s1174_s0  }
 0x46f   :  { %1030 = vmatmul.msk.f32.gmra.mxu2 %vm408_vm14, %v407_v30 }
 0x4ea   :  { %v444_v32 = vpop.f32.mrf.mxu2 }
 0x4eb   :  { %v445_v33 = vadd.f32 %v444_v32, %v420_v31 }
 0x4ed   :  { %v450_v35 = vmax.f32 %v445_v33, 0.0 }
 0x4ef   :  { %v452_v6 = vsel %vm77_vm1, %v450_v35, -inf }
 0x4f0   :  { %453 = vmax.xlane.f32.xlu0 %v452_v6 }
 0x4f2   :  { %v447_v19 = vpop.f32.mrf.mxu2 }
 0x4f3   :  { %v448_v36 = vadd.f32 %v447_v19, %v420_v31 }
 0x4f5   :  { %v451_v5 = vmax.f32 %v448_v36, 0.0 }
 0x4f7   :  { %v455_v22 = vsel %vm77_vm1, %v451_v5, -inf }
 0x4f8   :  { %456 = vmax.xlane.f32.xlu2 %v455_v22 }
 0x563   :  { %v454_v37 = vpop.xlane.xlu0 %453 }
 0x564   :  { %v458_v38 = vsub.f32 %v450_v35, %v454_v37 }
 0x566   :  { %v460_v39 = vmul.f32 1.442695, %v458_v38 }
 0x568   :  { %1066 = vpow2.f32 %v460_v39 }
 0x56b   :  { %v457_v40 = vpop.xlane.xlu2 %456 }
 0x56c   :  { %v459_v41 = vsub.f32 %v451_v5, %v457_v40 }
 0x56e   :  { %v1067_v42 = vpop.eup %1066  ;;  %v462_v43 = vmul.f32 1.442695, %v459_v41 }
 0x56f   :  { %v464_v44 = vsel %vm77_vm1, %v1067_v42, 0.0 }
 0x570   :  { %1068 = vpow2.f32 %v462_v43  ;;  %465 = vadd.xlane.f32.xlu2 %v464_v44 }
 0x576   :  { %v1069_v47 = vpop.eup %1068 }
 0x577   :  { %v467_v48 = vsel %vm77_vm1, %v1069_v47, 0.0 }
 0x578   :  { %468 = vadd.xlane.f32.xlu1 %v467_v48  ;;  %645 = vadd.xlane.f32.xlu2 %v644_v46 }
 0x580   :  { %642 = vadd.xlane.f32.xlu1 %v641_v50 }
 0x5e3   :  { %v466_v51 = vpop.xlane.xlu2 %465 }
 0x5e4   :  { %1070 = vrcp.f32 %v466_v51  ;;  %v481_v57 = vand.u32 2147483648, %v466_v51  ;;  %v479_v59 = vand.u32 2147483647, %v466_v51  ;;  %vm475_vm2 = vweird.f32 %v466_v51 }
 0x5e6   :  { %v482_v62 = vor.u32 1.1754944e-38, %v481_v57  ;;  %vm480_vm4 = vcmp.eq.f32.partialorder %v479_v59, 8.507059e+37 }
 0x5ea   :  { %v1071_v52 = vpop.eup %1070 }
 0x5eb   :  { %v471_v53 = vmul.f32 %v1071_v52, %v466_v51  ;;  %v469_v54 = vpop.xlane.xlu1 %468  ;;  %v646_v55 = vpop.xlane.xlu2 %645  ;;  %vm476_vm15 = vweird.f32 %v1071_v52 }
 0x5ec   :  { %1072 = vrcp.f32 %v469_v54  ;;  %vm477_vm3 = vmor %vm475_vm2, %vm476_vm15  ;;  %v496_v14 = vand.u32 2147483648, %v469_v54  ;;  %v494_v3 = vand.u32 2147483647, %v469_v54  ;;  %vm490_vm6 = vweird.f32 %v469_v54 }
 0x5ed   :  { %v472_v56 = vsub.f32 1.0, %v471_v53  ;;  %1074 = vrsqrt.f32 %v646_v55  ;;  %vm666_vm9 = vcmp.eq.f32.partialorder %v646_v55, inf  ;;  %v669_v29 = vand.u32 2147483648, %v646_v55 }
 0x5ee   :  { %v497_v23 = vor.u32 1.1754944e-38, %v496_v14  ;;  %vm495_vm8 = vcmp.eq.f32.partialorder %v494_v3, 8.507059e+37  ;;  %vm668_vm10 = vcmp.eq.f32.partialorder %v646_v55, 0.0 }
 0x5ef   :  { %v473_v58 = vmul.f32 %v1071_v52, %v472_v56 }
 0x5f1   :  { %v474_v60 = vadd.f32 %v1071_v52, %v473_v58 }
 0x5f2   :  { %v1073_v61 = vpop.eup %1072 }
 0x5f3   :  { %v1075_v63 = vpop.eup %1074  ;;  %v478_v4 = vsel %vm477_vm3, %v1071_v52, %v474_v60  ;;  %v486_v7 = vmul.f32 %v1073_v61, %v469_v54  ;;  %v643_v8 = vpop.xlane.xlu1 %642  ;;  %vm491_vm5 = vweird.f32 %v1073_v61 }
 0x5f4   :  { %v483_v9 = vsel %vm480_vm4, %v482_v62, %v478_v4  ;;  %v660_v10 = vmul.f32 %v1075_v63, %v646_v55  ;;  %1076 = vrsqrt.f32 %v643_v8  ;;  %vm492_vm7 = vmor %vm490_vm6, %vm491_vm5  ;;  %vm654_vm11 = vcmp.eq.f32.partialorder %v643_v8, inf }
 0x5f5   :  { %v1436_v11 = vmul.f32 %v1067_v42, %v483_v9  ;;  %v487_v13 = vsub.f32 1.0, %v486_v7  ;;  %v657_v38 = vand.u32 2147483648, %v643_v8  ;;  %vm656_vm12 = vcmp.eq.f32.partialorder %v643_v8, 0.0 }
 0x5f6   :  { %v661_v15 = vmul.f32 %v1075_v63, %v660_v10 }
 0x5f7   :  { %500 = vst.msk [vmem:[%s1587_s8] sm:$0xff] %vm77_vm1, %v1436_v11  ;;  %v488_v2 = vmul.f32 %v1073_v61, %v487_v13  ;;  %v732_v16 = vmul.f32 %v1436_v11, %v1436_v11  ;;  %v560_v43 = vsel %vm77_vm1, %v1436_v11, -inf }
 0x5f8   :  { %v662_v17 = vmul.f32 0.5, %v661_v15 }
 0x5f9   :  { %v489_v18 = vadd.f32 %v1073_v61, %v488_v2  ;;  %v734_v20 = vsel %vm77_vm1, %v732_v16, 0.0 }
 0x5fa   :  { %v1077_v21 = vpop.eup %1076  ;;  %v663_v24 = vsub.f32 1.5, %v662_v17  ;;  %735 = vadd.xlane.f32.xlu2 %v734_v20 }
 0x5fb   :  { %v493_v25 = vsel %vm492_vm7, %v1073_v61, %v489_v18  ;;  %v648_v12 = vmul.f32 %v1077_v21, %v643_v8 }
 0x5fc   :  { %v498_v26 = vsel %vm495_vm8, %v497_v23, %v493_v25  ;;  %v664_v27 = vmul.f32 %v1075_v63, %v663_v24 }
 0x5fd   :  { %v1446_v28 = vmul.f32 %v1069_v47, %v498_v26  ;;  %v649_v30 = vmul.f32 %v1077_v21, %v648_v12 }
 0x5fe   :  { %v665_v31 = vmul.f32 %v664_v27, %v646_v55 }
 0x5ff   :  { %501 = vst.msk [vmem:[%s1587_s8 + $0x8] sm:$0xff] %vm77_vm1, %v1446_v28  ;;  %v650_v32 = vmul.f32 0.5, %v649_v30  ;;  %1031 = vmatpush.xpose.msk.msrb.mxu3 %vm77_vm1, %v1446_v28  ;;  %v563_v33 = vsel %vm77_vm1, %v1446_v28, -inf  ;;  %v733_v35 = vmul.f32 %v1446_v28, %v1446_v28 }
 0x600   :  { %v667_v6 = vsel %vm666_vm9, %v646_v55, %v665_v31  ;;  %564 = vmax.xlane.f32.xlu1 %v563_v33 }
 0x601   :  { %v670_v19 = vsel %vm668_vm10, %v669_v29, %v667_v6  ;;  %v651_v36 = vsub.f32 1.5, %v650_v32  ;;  %v737_v5 = vsel %vm77_vm1, %v733_v35, 0.0 }
 0x602   :  { %v672_v22 = vmax.f32 %v670_v19, 1e-08  ;;  %738 = vadd.xlane.f32.xlu0 %v737_v5 }
 0x603   :  { %v652_v37 = vmul.f32 %v1077_v21, %v651_v36  ;;  %1032 = vmatpush.xpose.msk.msrb.mxu3 %vm77_vm1, %v1436_v11 }
 0x604   :  { %1078 = vrcp.f32 %v672_v22  ;;  %v699_v46 = vand.u32 2147483648, %v672_v22  ;;  %vm693_vm13 = vweird.f32 %v672_v22  ;;  %v697_v48 = vand.u32 2147483647, %v672_v22 }
 0x605   :  { %v653_v39 = vmul.f32 %v652_v37, %v643_v8 }
 0x606   :  { %1033 = vmatmul.msk.f32.vlgmr.msrb.gmra.mxu3 %vm77_vm1, %v1436_v11  ;;  %v700_v50 = vor.u32 1.1754944e-38, %v699_v46  ;;  %vm698_vm2 = vcmp.eq.f32.partialorder %v697_v48, 8.507059e+37 }
 0x607   :  { %v655_v40 = vsel %vm654_vm11, %v643_v8, %v653_v39 }
 0x608   :  { %v658_v41 = vsel %vm656_vm12, %v657_v38, %v655_v40 }
 0x609   :  { %v671_v42 = vmax.f32 %v658_v41, 1e-08 }
 0x60a   :  { %v1079_v44 = vpop.eup %1078  ;;  %561 = vmax.xlane.f32.xlu0 %v560_v43 }
 0x60b   :  { %1080 = vrcp.f32 %v671_v42  ;;  %v689_v45 = vmul.f32 %v1079_v44, %v672_v22  ;;  %vm694_vm14 = vweird.f32 %v1079_v44  ;;  %vm678_vm3 = vweird.f32 %v671_v42 }
 0x60c   :  { %vm695_vm15 = vmor %vm693_vm13, %vm694_vm14  ;;  %v684_v55 = vand.u32 2147483648, %v671_v42  ;;  %v682_v58 = vand.u32 2147483647, %v671_v42 }
 0x60d   :  { %v690_v47 = vsub.f32 1.0, %v689_v45 }
 0x60e   :  { %1034 = vmatmul.msk.f32.gmra.mxu3 %vm77_vm1, %v1446_v28  ;;  %v685_v61 = vor.u32 1.1754944e-38, %v684_v55  ;;  %vm683_vm6 = vcmp.eq.f32.partialorder %v682_v58, 8.507059e+37 }
 0x60f   :  { %v691_v49 = vmul.f32 %v1079_v44, %v690_v47 }
 0x611   :  { %v1081_v51 = vpop.eup %1080  ;;  %v692_v52 = vadd.f32 %v1079_v44, %v691_v49 }
 0x612   :  { %v674_v53 = vmul.f32 %v1081_v51, %v671_v42  ;;  %vm679_vm4 = vweird.f32 %v1081_v51 }
 0x613   :  { %v696_v54 = vsel %vm695_vm15, %v1079_v44, %v692_v52  ;;  %vm680_vm5 = vmor %vm678_vm3, %vm679_vm4 }
 0x614   :  { %v701_v56 = vsel %vm698_vm2, %v700_v50, %v696_v54  ;;  %v675_v57 = vsub.f32 1.0, %v674_v53 }
 0x615   :  { %v702_v59 = vmul.f32 %v701_v56, %v1234_v0 }
 0x616   :  { %v676_v60 = vmul.f32 %v1081_v51, %v675_v57 }
 0x617   :  { %1035 = vmatpush.xpose.msk.msra.mxu0 %vm77_vm1, %v702_v59 }
 0x618   :  { %v677_v62 = vadd.f32 %v1081_v51, %v676_v60 }
 0x61a   :  { %v681_v63 = vsel %vm680_vm5, %v1081_v51, %v677_v62 }
 0x61b   :  { %v686_v4 = vsel %vm683_vm6, %v685_v61, %v681_v63 }
 0x61c   :  { %v687_v7 = vmul.f32 %v686_v4, %v1239_v1 }
 0x61e   :  { %1036 = vmatpush.xpose.msk.msra.mxu0 %vm77_vm1, %v687_v7 }
 0x621   :  { %1037 = vmatmul.msk.f32.vlgmr.msra.gmra.mxu0 %vm77_vm1, %v687_v7 }
 0x629   :  { %1038 = vmatmul.msk.f32.gmra.mxu0 %vm77_vm1, %v702_v59 }
 0x66d   :  { %v736_v8 = vpop.xlane.xlu2 %735 }
 0x66e   :  { %1082 = vrsqrt.f32 %v736_v8  ;;  %vm747_vm7 = vcmp.eq.f32.partialorder %v736_v8, inf  ;;  %v750_v26 = vand.u32 2147483648, %v736_v8  ;;  %vm749_vm8 = vcmp.eq.f32.partialorder %v736_v8, 0.0 }
 0x673   :  { %v565_v0 = vpop.xlane.xlu1 %564 }
 0x674   :  { %v1083_v9 = vpop.eup %1082  ;;  %v567_v10 = vsub.f32 %v1446_v28, %v565_v0 }
 0x675   :  { %v741_v13 = vmul.f32 %v1083_v9, %v736_v8  ;;  %v739_v14 = vpop.xlane.xlu0 %738 }
 0x676   :  { %v570_v15 = vmul.f32 1.442695, %v567_v10  ;;  %1084 = vrsqrt.f32 %v739_v14  ;;  %vm759_vm9 = vcmp.eq.f32.partialorder %v739_v14, inf  ;;  %v762_v36 = vand.u32 2147483648, %v739_v14 }
 0x677   :  { %v742_v2 = vmul.f32 %v1083_v9, %v741_v13  ;;  %vm761_vm10 = vcmp.eq.f32.partialorder %v739_v14, 0.0 }
 0x678   :  { %1086 = vpow2.f32 %v570_v15 }
 0x679   :  { %v743_v3 = vmul.f32 0.5, %v742_v2 }
 0x67b   :  { %v744_v1 = vsub.f32 1.5, %v743_v3 }
 0x67c   :  { %v1085_v16 = vpop.eup %1084 }
 0x67d   :  { %v745_v17 = vmul.f32 %v1083_v9, %v744_v1  ;;  %v753_v18 = vmul.f32 %v1085_v16, %v739_v14  ;;  %v562_v20 = vpop.xlane.xlu0 %561 }
 0x67e   :  { %v1475_v21 = vpop.eup %1086  ;;  %v566_v23 = vsub.f32 %v1436_v11, %v562_v20 }
 0x67f   :  { %v746_v24 = vmul.f32 %v745_v17, %v736_v8  ;;  %v754_v25 = vmul.f32 %v1085_v16, %v753_v18  ;;  %v575_v12 = vsel %vm77_vm1, %v1475_v21, 0.0 }
 0x680   :  { %v568_v27 = vmul.f32 1.442695, %v566_v23  ;;  %576 = vadd.xlane.f32.xlu0 %v575_v12 }
 0x681   :  { %v748_v29 = vsel %vm747_vm7, %v736_v8, %v746_v24  ;;  %v755_v30 = vmul.f32 0.5, %v754_v25 }
 0x682   :  { %v751_v31 = vsel %vm749_vm8, %v750_v26, %v748_v29  ;;  %1088 = vpow2.f32 %v568_v27 }
 0x683   :  { %v764_v32 = vmax.f32 %v751_v31, 1e-08  ;;  %v756_v33 = vsub.f32 1.5, %v755_v30 }
 0x685   :  { %1090 = vrcp.f32 %v764_v32  ;;  %v757_v35 = vmul.f32 %v1085_v16, %v756_v33  ;;  %vm771_vm13 = vweird.f32 %v764_v32  ;;  %v777_v50 = vand.u32 2147483648, %v764_v32 }
 0x686   :  { %v775_v52 = vand.u32 2147483647, %v764_v32 }
 0x687   :  { %v758_v6 = vmul.f32 %v757_v35, %v739_v14  ;;  %v778_v57 = vor.u32 1.1754944e-38, %v777_v50 }
 0x688   :  { %v1480_v19 = vpop.eup %1088  ;;  %vm776_vm4 = vcmp.eq.f32.partialorder %v775_v52, 8.507059e+37 }
 0x689   :  { %v760_v5 = vsel %vm759_vm9, %v739_v14, %v758_v6  ;;  %v572_v22 = vsel %vm77_vm1, %v1480_v19, 0.0 }
 0x68a   :  { %v763_v37 = vsel %vm761_vm10, %v762_v36, %v760_v5  ;;  %573 = vadd.xlane.f32.xlu2 %v572_v22  ;;  %v525_v5 = vpop.f32.mrf.mxu3 }
 0x68b   :  { %v1091_v38 = vpop.eup %1090  ;;  %v765_v39 = vmax.f32 %v763_v37, 1e-08 }
 0x68c   :  { %v767_v40 = vmul.f32 %v1091_v38, %v764_v32  ;;  %vm772_vm11 = vweird.f32 %v1091_v38 }
 0x68d   :  { %1092 = vrcp.f32 %v765_v39  ;;  %v792_v46 = vand.u32 2147483648, %v765_v39  ;;  %v790_v48 = vand.u32 2147483647, %v765_v39  ;;  %vm786_vm14 = vweird.f32 %v765_v39  ;;  %vm773_vm15 = vmor %vm771_vm13, %vm772_vm11 }
 0x68e   :  { %v768_v41 = vsub.f32 1.0, %v767_v40 }
 0x68f   :  { %v793_v53 = vor.u32 1.1754944e-38, %v792_v46  ;;  %vm791_vm3 = vcmp.eq.f32.partialorder %v790_v48, 8.507059e+37 }
 0x690   :  { %v769_v44 = vmul.f32 %v1091_v38, %v768_v41 }
 0x692   :  { %v770_v49 = vadd.f32 %v1091_v38, %v769_v44  ;;  %v528_v41 = vpop.f32.mrf.mxu3 }
 0x693   :  { %v1093_v42 = vpop.eup %1092 }
 0x694   :  { %v782_v43 = vmul.f32 %v1093_v42, %v765_v39  ;;  %vm787_vm12 = vweird.f32 %v1093_v42  ;;  %v774_v55 = vsel %vm773_vm15, %v1091_v38, %v770_v49 }
 0x695   :  { %vm788_vm2 = vmor %vm786_vm14, %vm787_vm12  ;;  %v779_v61 = vsel %vm776_vm4, %v778_v57, %v774_v55 }
 0x696   :  { %v783_v45 = vsub.f32 1.0, %v782_v43  ;;  %v780_v63 = vmul.f32 %v779_v61, %v1436_v11 }
 0x698   :  { %v784_v47 = vmul.f32 %v1093_v42, %v783_v45  ;;  %v1121_v45 = vld [vmem:[%s1580_s1] sm:$0xff] }
 0x699   :  { %v531_v46 = vsub.f32 %v525_v5, %v1121_v45 }
 0x69a   :  { %v785_v51 = vadd.f32 %v1093_v42, %v784_v47 }
 0x69c   :  { %v789_v54 = vsel %vm788_vm2, %v1093_v42, %v785_v51  ;;  %v533_v51 = vmul.f32 %v531_v46, %v531_v46  ;;  %vm624_vm2 = vcmask 7168  }
 0x69d   :  { %v794_v56 = vsel %vm791_vm3, %v793_v53, %v789_v54 }
 0x69e   :  { %v1484_v58 = vpop.f32.mrf.mxu0  ;;  %v795_v59 = vmul.f32 %v794_v56, %v1446_v28  ;;  %v535_v53 = vsel %vm39_vm0, %v533_v51, 0.0 }
 0x69f   :  { %v825_v60 = vmul.f32 %v1484_v58, %v1484_v58 }
 0x6a0   :  { %1039 = vmatpush.xpose.msk.msra.mxu1 %vm77_vm1, %v795_v59 }
 0x6a1   :  { %v827_v62 = vsel %vm39_vm0, %v825_v60, 0.0 }
 0x6a2   :  { %828 = vadd.xlane.f32.xlu1 %v827_v62 }
 0x6a4   :  { %1040 = vmatpush.xpose.msk.msra.mxu1 %vm77_vm1, %v780_v63 }
 0x6a6   :  { %v1493_v4 = vpop.f32.mrf.mxu0 }
 0x6a7   :  { %v826_v7 = vmul.f32 %v1493_v4, %v1493_v4  ;;  %1041 = vmatmul.msk.f32.vlgmr.msra.gmra.mxu1 %vm77_vm1, %v780_v63 }
 0x6a9   :  { %v830_v28 = vsel %vm39_vm0, %v826_v7, 0.0 }
 0x6aa   :  { %831 = vadd.xlane.f32.xlu2 %v830_v28 }
 0x6af   :  { %1042 = vmatmul.msk.f32.gmra.mxu1 %vm77_vm1, %v795_v59 }
 0x6f3   :  { %v577_v8 = vpop.xlane.xlu0 %576 }
 0x6f4   :  { %1094 = vrcp.f32 %v577_v8  ;;  %v604_v23 = vand.u32 2147483648, %v577_v8  ;;  %vm598_vm10 = vweird.f32 %v577_v8  ;;  %v602_v12 = vand.u32 2147483647, %v577_v8 }
 0x6f6   :  { %v605_v29 = vor.u32 1.1754944e-38, %v604_v23  ;;  %vm603_vm12 = vcmp.eq.f32.partialorder %v602_v12, 8.507059e+37 }
 0x6fa   :  { %v1095_v0 = vpop.eup %1094 }
 0x6fb   :  { %v594_v11 = vmul.f32 %v1095_v0, %v577_v8  ;;  %vm599_vm7 = vweird.f32 %v1095_v0 }
 0x6fc   :  { %vm600_vm11 = vmor %vm598_vm10, %vm599_vm7 }
 0x6fd   :  { %v574_v9 = vpop.xlane.xlu2 %573  ;;  %v595_v13 = vsub.f32 1.0, %v594_v11 }
 0x6fe   :  { %1096 = vrcp.f32 %v574_v9  ;;  %v589_v3 = vand.u32 2147483648, %v574_v9  ;;  %v587_v16 = vand.u32 2147483647, %v574_v9  ;;  %vm583_vm6 = vweird.f32 %v574_v9 }
 0x6ff   :  { %v596_v2 = vmul.f32 %v1095_v0, %v595_v13 }
 0x700   :  { %v590_v18 = vor.u32 1.1754944e-38, %v589_v3  ;;  %vm588_vm9 = vcmp.eq.f32.partialorder %v587_v16, 8.507059e+37 }
 0x701   :  { %v597_v20 = vadd.f32 %v1095_v0, %v596_v2 }
 0x703   :  { %v601_v27 = vsel %vm600_vm11, %v1095_v0, %v597_v20 }
 0x704   :  { %v1097_v10 = vpop.eup %1096  ;;  %v606_v31 = vsel %vm603_vm12, %v605_v29, %v601_v27 }
 0x705   :  { %v579_v14 = vmul.f32 %v1097_v10, %v574_v9  ;;  %vm584_vm5 = vweird.f32 %v1097_v10  ;;  %v607_v32 = vmul.f32 %v1475_v21, %v606_v31  ;;  %v1120_v21 = vld [vmem:[%s1580_s1 + $0x8] sm:$0xff] }
 0x706   :  { %vm585_vm8 = vmor %vm583_vm6, %vm584_vm5  ;;  %v532_v42 = vsub.f32 %v528_v41, %v1120_v21 }
 0x707   :  { %v580_v15 = vsub.f32 1.0, %v579_v14  ;;  %v609_v6 = vadd.f32 1e-15, %v607_v32 }
 0x708   :  { %v534_v48 = vmul.f32 %v532_v42, %v532_v42 }
 0x709   :  { %v581_v1 = vmul.f32 %v1097_v10, %v580_v15 }
 0x70a   :  { %v536_v52 = vsel %vm39_vm0, %v534_v48, 0.0 }
 0x70b   :  { %v582_v17 = vadd.f32 %v1097_v10, %v581_v1  ;;  %v537_v54 = vadd.f32 %v536_v52, %v535_v53 }
 0x70d   :  { %v586_v24 = vsel %vm585_vm8, %v1097_v10, %v582_v17 }
 0x70e   :  { %v591_v25 = vsel %vm588_vm9, %v590_v18, %v586_v24 }
 0x70f   :  { %v592_v26 = vmul.f32 %v1480_v19, %v591_v25 }
 0x711   :  { %v608_v30 = vadd.f32 1e-15, %v592_v26 }
 0x713   :  { %1098 = vlog2.f32 %v608_v30 }
 0x714   :  { %1100 = vlog2.f32 %v609_v6 }
 0x715   :  { %v829_v55 = vpop.xlane.xlu1 %828 }
 0x716   :  { %1102 = vrsqrt.f32 %v829_v55  ;;  %v843_v14 = vand.u32 2147483648, %v829_v55  ;;  %vm842_vm13 = vcmp.eq.f32.partialorder %v829_v55, 0.0 }
 0x719   :  { %v1099_v33 = vpop.eup %1098 }
 0x71a   :  { %v611_v35 = vmul.f32 0.6931472, %v1099_v33  ;;  %v1101_v37 = vpop.eup %1100 }
 0x71b   :  { %v613_v40 = vmul.f32 0.6931472, %v1101_v37 }
 0x71c   :  { %v614_v36 = vmul.f32 %v611_v35, %v592_v26  ;;  %v1103_v57 = vpop.eup %1102 }
 0x71d   :  { %v615_v43 = vmul.f32 %v613_v40, %v607_v32  ;;  %v832_v56 = vpop.xlane.xlu2 %831  ;;  %v834_v60 = vmul.f32 %v1103_v57, %v829_v55 }
 0x71e   :  { %v616_v22 = vsel %vm77_vm1, %v614_v36, 0.0  ;;  %1104 = vrsqrt.f32 %v832_v56  ;;  %vm852_vm14 = vcmp.eq.f32.partialorder %v832_v56, inf  ;;  %vm854_vm15 = vcmp.eq.f32.partialorder %v832_v56, 0.0 }
 0x71f   :  { %617 = vadd.xlane.f32.xlu2 %v616_v22  ;;  %v619_v50 = vsel %vm77_vm1, %v615_v43, 0.0  ;;  %v835_v62 = vmul.f32 %v1103_v57, %v834_v60  ;;  %vm840_vm1 = vcmp.eq.f32.partialorder %v829_v55, inf  ;;  %v855_v16 = vand.u32 2147483648, %v832_v56 }
 0x721   :  { %v836_v7 = vmul.f32 0.5, %v835_v62 }
 0x723   :  { %v837_v8 = vsub.f32 1.5, %v836_v7 }
 0x724   :  { %v1503_v38 = vpop.f32.mrf.mxu1  ;;  %v1105_v59 = vpop.eup %1104 }
 0x725   :  { %v889_v19 = vmul.f32 %v1503_v38, %v1503_v38  ;;  %v846_v61 = vmul.f32 %v1105_v59, %v832_v56  ;;  %v838_v9 = vmul.f32 %v1103_v57, %v837_v8 }
 0x727   :  { %v891_v39 = vsel %vm39_vm0, %v889_v19, 0.0  ;;  %v847_v63 = vmul.f32 %v1105_v59, %v846_v61  ;;  %v839_v13 = vmul.f32 %v838_v9, %v829_v55 }
 0x728   :  { %892 = vadd.xlane.f32.xlu0 %v891_v39 }
 0x729   :  { %v848_v28 = vmul.f32 0.5, %v847_v63  ;;  %v841_v2 = vsel %vm840_vm1, %v829_v55, %v839_v13 }
 0x72a   :  { %v844_v17 = vsel %vm842_vm13, %v843_v14, %v841_v2 }
 0x72b   :  { %v849_v0 = vsub.f32 1.5, %v848_v28  ;;  %v1522_v27 = vmax.f32 %v844_v17, 1e-08 }
 0x72c   :  { %v1511_v44 = vpop.f32.mrf.mxu1 }
 0x72d   :  { %v890_v47 = vmul.f32 %v1511_v44, %v1511_v44  ;;  %v850_v11 = vmul.f32 %v1105_v59, %v849_v0  ;;  %vm864_vm7 = vweird.f32 %v1522_v27 }
 0x72f   :  { %v894_v49 = vsel %vm39_vm0, %v890_v47, 0.0  ;;  %v851_v15 = vmul.f32 %v850_v11, %v832_v56  ;;  %v868_v11 = vand.u32 2147483647, %v1522_v27 }
 0x730   :  { %895 = vadd.xlane.f32.xlu1 %v894_v49  ;;  %620 = vadd.xlane.f32.xlu0 %v619_v50 }
 0x731   :  { %v853_v18 = vsel %vm852_vm14, %v832_v56, %v851_v15  ;;  %v870_v15 = vand.u32 2147483648, %v1522_v27 }
 0x732   :  { %v856_v29 = vsel %vm854_vm15, %v855_v16, %v853_v18  ;;  %vm869_vm15 = vcmp.eq.f32.partialorder %v868_v11, 8.507059e+37 }
 0x733   :  { %v1524_v35 = vmax.f32 %v856_v29, 1e-08 }
 0x735   :  { %vm879_vm10 = vweird.f32 %v1524_v35  ;;  %v883_v18 = vand.u32 2147483647, %v1524_v35 }
 0x738   :  { %538 = vadd.xlane.f32.xlu1 %v537_v54 }
 0x792   :  { %v618_v3 = vpop.xlane.xlu2 %617 }
 0x793   :  { %v622_v20 = vsub.f32 0.0, %v618_v3 }
 0x795   :  { %v625_v31 = vsel %vm624_vm2, %v622_v20, 0.0  ;;  %v885_v20 = vand.u32 2147483648, %v1524_v35 }
 0x79b   :  { %v893_v10 = vpop.xlane.xlu0 %892 }
 0x79c   :  { %1106 = vrsqrt.f32 %v893_v10  ;;  %vm904_vm3 = vcmp.eq.f32.partialorder %v893_v10, inf  ;;  %v907_v41 = vand.u32 2147483648, %v893_v10  ;;  %vm906_vm4 = vcmp.eq.f32.partialorder %v893_v10, 0.0 }
 0x7a2   :  { %v1107_v1 = vpop.eup %1106 }
 0x7a3   :  { %v898_v23 = vmul.f32 %v1107_v1, %v893_v10  ;;  %v896_v24 = vpop.xlane.xlu1 %895  ;;  %v621_v25 = vpop.xlane.xlu0 %620 }
 0x7a4   :  { %1108 = vrsqrt.f32 %v896_v24  ;;  %v623_v26 = vsub.f32 0.0, %v621_v25  ;;  %vm916_vm5 = vcmp.eq.f32.partialorder %v896_v24, inf  ;;  %v919_v56 = vand.u32 2147483648, %v896_v24 }
 0x7a5   :  { %v899_v12 = vmul.f32 %v1107_v1, %v898_v23  ;;  %1110 = vrcp.f32 %v1522_v27  ;;  %vm918_vm6 = vcmp.eq.f32.partialorder %v896_v24, 0.0 }
 0x7a6   :  { %v626_v32 = vsel %vm624_vm2, %v623_v26, 0.0  ;;  %1112 = vrcp.f32 %v1524_v35 }
 0x7a7   :  { %v900_v30 = vmul.f32 0.5, %v899_v12  ;;  %v627_v33 = vadd.f32 %v626_v32, %v625_v31  ;;  %v871_v12 = vor.u32 1.1754944e-38, %v870_v15  ;;  %v886_v31 = vor.u32 1.1754944e-38, %v885_v20 }
 0x7a9   :  { %v901_v6 = vsub.f32 1.5, %v900_v30  ;;  %628 = vadd.xlane.f32.xlu2 %v627_v33 }
 0x7aa   :  { %v1109_v36 = vpop.eup %1108 }
 0x7ab   :  { %v902_v5 = vmul.f32 %v1107_v1, %v901_v6  ;;  %v910_v22 = vmul.f32 %v1109_v36, %v896_v24  ;;  %v539_v37 = vpop.xlane.xlu1 %538  ;;  %v1528_v45 = vpop.eup %1110 }
 0x7ac   :  { %v540_v19 = vrot.slane %v539_v37, 4  ;;  %v1530_v51 = vpop.eup %1112  ;;  %v860_v53 = vmul.f32 %v1528_v45, %v1522_v27  ;;  %vm865_vm8 = vweird.f32 %v1528_v45 }
 0x7ad   :  { %v903_v39 = vmul.f32 %v902_v5, %v893_v10  ;;  %v911_v40 = vmul.f32 %v1109_v36, %v910_v22  ;;  %v875_v59 = vmul.f32 %v1530_v51, %v1524_v35  ;;  %vm1544_vm11 = vmor %vm864_vm7, %vm865_vm8  ;;  %vm880_vm12 = vweird.f32 %v1530_v51 }
 0x7ae   :  { %v541_v21 = vadd.f32 %v540_v19, %v539_v37  ;;  %v861_v61 = vsub.f32 1.0, %v860_v53  ;;  %vm1554_vm14 = vmor %vm879_vm10, %vm880_vm12 }
 0x7af   :  { %v905_v42 = vsel %vm904_vm3, %v893_v10, %v903_v39  ;;  %v912_v43 = vmul.f32 0.5, %v911_v40  ;;  %v876_v28 = vsub.f32 1.0, %v875_v59  ;;  %vm884_vm3 = vcmp.eq.f32.partialorder %v883_v18, 8.507059e+37 }
 0x7b0   :  { %v908_v46 = vsel %vm906_vm4, %v907_v41, %v905_v42  ;;  %v542_v47 = vrot.slane %v541_v21, 2  ;;  %v862_v0 = vmul.f32 %v1528_v45, %v861_v61 }
 0x7b1   :  { %v921_v48 = vmax.f32 %v908_v46, 1e-08  ;;  %v913_v49 = vsub.f32 1.5, %v912_v43  ;;  %v877_v10 = vmul.f32 %v1530_v51, %v876_v28 }
 0x7b2   :  { %v543_v50 = vadd.f32 %v542_v47, %v541_v21  ;;  %v863_v14 = vadd.f32 %v1528_v45, %v862_v0  ;;  %v970_v0 = vlaneseq }
 0x7b3   :  { %1114 = vrcp.f32 %v921_v48  ;;  %v914_v52 = vmul.f32 %v1109_v36, %v913_v49  ;;  %v934_v2 = vand.u32 2147483648, %v921_v48  ;;  %vm928_vm1 = vweird.f32 %v921_v48 }
 0x7b4   :  { %v544_v54 = vrot.slane %v543_v50, 1  ;;  %v932_v16 = vand.u32 2147483647, %v921_v48  ;;  %v878_v23 = vadd.f32 %v1530_v51, %v877_v10  ;;  %v867_v29 = vsel %vm1544_vm11, %v1528_v45, %v863_v14 }
 0x7b5   :  { %v915_v55 = vmul.f32 %v914_v52, %v896_v24  ;;  %v935_v27 = vor.u32 1.1754944e-38, %v934_v2  ;;  %v872_v5 = vsel %vm869_vm15, %v871_v12, %v867_v29  ;;  %v971_v11 = vand.u32 127, %v970_v0 }
 0x7b6   :  { %v545_v57 = vadd.f32 %v544_v54, %v543_v50  ;;  %vm933_vm2 = vcmp.eq.f32.partialorder %v932_v16, 8.507059e+37  ;;  %v882_v35 = vsel %vm1554_vm14, %v1530_v51, %v878_v23  ;;  %v873_v40 = vmul.f32 %v872_v5, %v1484_v58 }
 0x7b7   :  { %v917_v60 = vsel %vm916_vm5, %v896_v24, %v915_v55  ;;  %v887_v19 = vsel %vm884_vm3, %v886_v31, %v882_v35  ;;  %vm972_vm10 = vcmp.eq.s32.totalorder %v971_v11, 0 }
 0x7b8   :  { %v920_v62 = vsel %vm918_vm6, %v919_v56, %v917_v60  ;;  %1045 = vpush %v545_v57  ;;  %v888_v42 = vmul.f32 %v887_v19, %v1493_v4 }
 0x7b9   :  { %v1115_v63 = vpop.eup %1114  ;;  %v922_v7 = vmax.f32 %v920_v62, 1e-08 }
 0x7ba   :  { %v924_v8 = vmul.f32 %v1115_v63, %v921_v48  ;;  %vm929_vm9 = vweird.f32 %v1115_v63 }
 0x7bb   :  { %1116 = vrcp.f32 %v922_v7  ;;  %vm930_vm13 = vmor %vm928_vm1, %vm929_vm9  ;;  %v949_v33 = vand.u32 2147483648, %v922_v7  ;;  %v947_v36 = vand.u32 2147483647, %v922_v7  ;;  %vm943_vm5 = vweird.f32 %v922_v7 }
 0x7bc   :  { %v925_v9 = vsub.f32 1.0, %v924_v8  ;;  %vm973_vm9 = vcmp.eq.s32.totalorder %v971_v11, 1 }
 0x7bd   :  { %v950_v39 = vor.u32 1.1754944e-38, %v949_v33  ;;  %vm948_vm7 = vcmp.eq.f32.partialorder %v947_v36, 8.507059e+37 }
 0x7be   :  { %v926_v13 = vmul.f32 %v1115_v63, %v925_v9 }
 0x7c0   :  { %v927_v1 = vadd.f32 %v1115_v63, %v926_v13 }
 0x7c1   :  { %v1117_v17 = vpop.eup %1116 }
 0x7c2   :  { %v931_v24 = vsel %vm930_vm13, %v1115_v63, %v927_v1  ;;  %v939_v25 = vmul.f32 %v1117_v17, %v922_v7  ;;  %vm944_vm4 = vweird.f32 %v1117_v17 }
 0x7c3   :  { %v936_v32 = vsel %vm933_vm2, %v935_v27, %v931_v24  ;;  %vm945_vm6 = vmor %vm943_vm5, %vm944_vm4 }
 0x7c4   :  { %v940_v30 = vsub.f32 1.0, %v939_v25  ;;  %v937_v22 = vmul.f32 %v936_v32, %v1503_v38 }
 0x7c6   :  { %v941_v6 = vmul.f32 %v1117_v17, %v940_v30  ;;  %v953_v45 = vmul.f32 %v937_v22, %v873_v40 }
 0x7c8   :  { %v942_v37 = vadd.f32 %v1117_v17, %v941_v6  ;;  %v955_v47 = vsel %vm39_vm0, %v953_v45, 0.0 }
 0x7ca   :  { %v946_v41 = vsel %vm945_vm6, %v1117_v17, %v942_v37 }
 0x7cb   :  { %v951_v21 = vsel %vm948_vm7, %v950_v39, %v946_v41 }
 0x7cc   :  { %v952_v43 = vmul.f32 %v951_v21, %v1511_v44 }
 0x7ce   :  { %v954_v46 = vmul.f32 %v952_v43, %v888_v42 }
 0x7d0   :  { %v956_v38 = vsel %vm39_vm0, %v954_v46, 0.0  ;;  %vm974_vm0 = vcmp.eq.s32.totalorder %v971_v11, 2 }
 0x7d1   :  { %v957_v48 = vadd.f32 %v956_v38, %v955_v47 }
 0x7d3   :  { %958 = vadd.xlane.f32.xlu0 %v957_v48 }
 0x7e9   :  { %s1046_s7 = spop %1045 }
 0x7ea   :  { %v547_v61 = vstv %s1046_s7 }
 0x7eb   :  { %1118 = vrsqrt.f32 %v547_v61  ;;  %vm555_vm8 = vcmp.eq.f32.partialorder %v547_v61, inf  ;;  %v558_v16 = vand.u32 2147483648, %v547_v61  ;;  %vm557_vm11 = vcmp.eq.f32.partialorder %v547_v61, 0.0 }
 0x7f1   :  { %v1119_v62 = vpop.eup %1118 }
 0x7f2   :  { %v549_v63 = vmul.f32 %v1119_v62, %v547_v61 }
 0x7f4   :  { %v550_v7 = vmul.f32 %v1119_v62, %v549_v63 }
 0x7f6   :  { %v551_v28 = vmul.f32 0.5, %v550_v7 }
 0x7f8   :  { %v552_v8 = vsub.f32 1.5, %v551_v28 }
 0x7fa   :  { %v553_v9 = vmul.f32 %v1119_v62, %v552_v8 }
 0x7fc   :  { %v554_v10 = vmul.f32 %v553_v9, %v547_v61 }
 0x7fe   :  { %v556_v3 = vsel %vm555_vm8, %v547_v61, %v554_v10 }
 0x7ff   :  { %v559_v18 = vsel %vm557_vm11, %v558_v16, %v556_v3 }
 0x81c   :  { %v629_v58 = vpop.xlane.xlu2 %628 }
 0x81d   :  { %v630_v4 = vrot.slane %v629_v58, 4 }
 0x81f   :  { %v631_v44 = vadd.f32 %v630_v4, %v629_v58 }
 0x821   :  { %v632_v49 = vrot.slane %v631_v44, 2 }
 0x823   :  { %v633_v50 = vadd.f32 %v632_v49, %v631_v44 }
 0x825   :  { %v634_v51 = vrot.slane %v633_v50, 1 }
 0x827   :  { %v635_v52 = vadd.f32 %v634_v51, %v633_v50 }
 0x829   :  { %1047 = vpush %v635_v52 }
 0x846   :  { %v959_v53 = vpop.xlane.xlu0 %958 }
 0x847   :  { %v960_v54 = vrot.slane %v959_v53, 4 }
 0x849   :  { %v961_v55 = vadd.f32 %v960_v54, %v959_v53 }
 0x84b   :  { %v962_v56 = vrot.slane %v961_v55, 2 }
 0x84d   :  { %v963_v57 = vadd.f32 %v962_v56, %v961_v55 }
 0x84f   :  { %v964_v59 = vrot.slane %v963_v57, 1 }
 0x851   :  { %v965_v60 = vadd.f32 %v964_v59, %v963_v57 }
 0x853   :  { %1049 = vpush %v965_v60 }
 0x85a   :  { %s1048_s0 = spop %1047 }
 0x85b   :  { %v637_v14 = vstv %s1048_s0 }
 0x85c   :  { %v638_v1 = vmul.f32 %v637_v14, %v1281_v34 }
 0x884   :  { %s1050_s17 = spop %1049 }
 0x885   :  { %v967_v13 = vstv %s1050_s17 }
 0x886   :  { %v968_v15 = vsub.f32 0.0, %v967_v13 }
 0x888   :  { %v969_v2 = vmul.f32 %v968_v15, %v1281_v34 }
 0x88a   :  { %v975_v17 = vsel %vm974_vm0, %v969_v2, 0.0 }
 0x88b   :  { %v976_v20 = vsel %vm973_vm9, %v638_v1, %v975_v17 }
 0x88c   :  { %v977_v23 = vsel %vm972_vm10, %v559_v18, %v976_v20 }
 0x88d   :  { %978 = vst [vmem:[#allocation4] sm:$0x1] %v977_v23 }
 0x88e   :  { %1004 = dma.vmem_to_hbm [thread:$0]  %s1000_s18, 16, %s1002_s21, [#allocation5]  }
 0x88f   :  { %1170 = dma.done.wait [#allocation3], 256  }
 0x890   :  { %1171 = vsyncadd [#allocation3], 4294967040 }
 0x891   :  { %1172 = dma.done.wait [#allocation5], 16  }
 0x892   :  { %1173 = vsyncadd [#allocation5], 4294967280 }
 0x893   :  { %1015 = vsyncpa [#allocation3], 1 }
 0x894   :  { %1016 = vsyncpa [#allocation5], 1 }

</bundles_post_ra>
